<compile_context>
chip_gen: v5e
topology: v5e:2x2
jax: 0.10.0
libtpu: 0.0.40
codegen_flags: <defaults>
</compile_context>

<pallas_src>
import numpy as np
import jax
import jax.numpy as jnp
from jax.experimental import pallas as pl
from jax.experimental.pallas import tpu as pltpu


def _gaussian_1d(kernel_size: int, sigma: float) -> np.ndarray:
    # Matches torch.arange((1-k)/2, (1+k)/2) -> exp(-(t/sigma)^2 / 2), normalized.
    start = (1.0 - kernel_size) / 2.0
    coords = np.arange(start, start + kernel_size, 1.0, dtype=np.float64)
    k = np.exp(-((coords / sigma) ** 2) / 2.0)
    return k / k.sum()


def _band_matrix(n: int, w1d: np.ndarray) -> np.ndarray:
    """(n, n) banded matrix M with M[a, a+d] = w[d+pad]; bands clipped at the
    edges, which exactly encodes F.conv2d's zero padding (pad = k//2)."""
    K = len(w1d)
    pad = K // 2
    m = np.zeros((n, n), dtype=np.float64)
    for d in range(-pad, pad + 1):
        val = w1d[d + pad]
        for a in range(n):
            b = a + d
            if 0 <= b < n:
                m[a, b] = val
    return m


def _block_diag(b: np.ndarray, reps: int) -> np.ndarray:
    n = b.shape[0]
    out = np.zeros((n * reps, n * reps), dtype=np.float64)
    for r in range(reps):
        out[r * n:(r + 1) * n, r * n:(r + 1) * n] = b
    return out


def _make_ssim_kernel(R: int, W: int):
    """One grid step processes a (R, W) slab = Pblk stacked (H, W) planes."""
    c1 = 0.01 ** 2
    c2 = 0.03 ** 2

    def kernel(bvb_ref, bh5_ref, x_ref, y_ref, out_ref):
        xs = x_ref[...]                      # (R, W) f32
        ys = y_ref[...]

        # Five quantities stacked along the lane axis -> one lane-dense operand.
        s = jnp.concatenate([xs, ys, xs * xs, ys * ys, xs * ys], axis=1)  # (R, 5W)

        # Separable Gaussian blur (zero padded) == two banded matmuls on the MXU.
        sh = jnp.dot(s, bh5_ref[...], preferred_element_type=jnp.float32)   # horizontal
        u = jnp.dot(bvb_ref[...], sh, preferred_element_type=jnp.float32)   # vertical (per-plane)

        ux = u[:, 0 * W:1 * W]
        uy = u[:, 1 * W:2 * W]
        uxux = ux * ux
        uyuy = uy * uy
        uxuy = ux * uy
        vx = u[:, 2 * W:3 * W] - uxux
        vy = u[:, 3 * W:4 * W] - uyuy
        vxy = u[:, 4 * W:5 * W] - uxuy

        num = (2.0 * uxuy + c1) * (2.0 * vxy + c2)
        den = (uxux + uyuy + c1) * (vx + vy + c2)
        ssim = num * pl.reciprocal(den, approx=True)

        # Per-row partial sums; the global reduction happens outside the kernel.
        out_ref[...] = jnp.sum(ssim, axis=1, keepdims=True)  # (R, 1)

    return kernel


def ssim_loss(x: jax.Array, y: jax.Array, kernel_size: int = 7, sigma: float = 1.5):
    """1 - SSIM(x, y).  x, y: float NCHW arrays of identical shape."""
    assert x.shape == y.shape and x.ndim == 4
    N, C, H, W = x.shape
    P = N * C
    assert H % 8 == 0, "H must be a multiple of 8 (sublane tile)"
    # TODO(synk): very large H/W would need row-tiling with a (K-1)-row halo
    # instead of whole-plane banded matrices; not needed at these sizes.

    # Planes per grid step: largest divisor of P with Pblk*H <= 512 rows.
    pblk = 1
    for d in range(1, P + 1):
        if P % d == 0 and d * H <= 512:
            pblk = d
    R = pblk * H            # rows per grid step
    G = P // pblk           # grid size (parallel)

    w1d = _gaussian_1d(kernel_size, sigma)
    bv = _band_matrix(H, w1d)
    bh = _band_matrix(W, w1d)
    bvb = jnp.asarray(_block_diag(bv, pblk), dtype=jnp.float32)   # (R, R)
    bh5 = jnp.asarray(_block_diag(bh, 5), dtype=jnp.float32)      # (5W, 5W)

    # Free reshape (contiguous merge) -- no padding pass, no extra HBM traffic.
    xs = x.astype(jnp.float32).reshape(P * H, W)
    ys = y.astype(jnp.float32).reshape(P * H, W)

    flops_per_step = 2 * R * (5 * W) * (5 * W) + 2 * R * R * (5 * W) + 30 * R * W
    cost = pl.CostEstimate(
        flops=int(G * flops_per_step),
        transcendentals=int(G * R * W),
        bytes_accessed=int(4 * (2 * P * H * W + R * R + 25 * W * W + G * R)),
    )

    # Generous but bounded VMEM budget (double-buffered inputs + constants + temps).
    step_bytes = 4 * (2 * 2 * R * W + R * R + 25 * W * W + 16 * R * 5 * W)
    vmem_limit = int(min(64 * 2 ** 20, max(32 * 2 ** 20, 4 * step_bytes)))

    partial = pl.pallas_call(
        _make_ssim_kernel(R, W),
        out_shape=jax.ShapeDtypeStruct((G * R, 1), jnp.float32),
        grid=(G,),
        in_specs=[
            pl.BlockSpec((R, R), lambda g: (0, 0)),          # blockdiag(Bv) - resident
            pl.BlockSpec((5 * W, 5 * W), lambda g: (0, 0)),  # blockdiag(Bh x 5) - resident
            pl.BlockSpec((R, W), lambda g: (g, 0)),          # x planes
            pl.BlockSpec((R, W), lambda g: (g, 0)),          # y planes
        ],
        out_specs=pl.BlockSpec((R, 1), lambda g: (g, 0)),
        compiler_params=pltpu.CompilerParams(
            dimension_semantics=("parallel",),
            vmem_limit_bytes=vmem_limit,
        ),
        cost_estimate=cost,
    )(bvb, bh5, xs, ys)

    mean_ssim = jnp.sum(partial) / float(N * C * H * W)
    return 1.0 - mean_ssim


def _ssim_loss_reference(x, y, kernel_size=7, sigma=1.5):
    """Pure-JAX reference (same math, XLA path) for a sanity check."""
    w1d = _gaussian_1d(kernel_size, sigma)
    N, C, H, W = x.shape
    bv = jnp.asarray(_band_matrix(H, w1d), jnp.float32)
    bh = jnp.asarray(_band_matrix(W, w1d), jnp.float32)

    def blur(p):
        p = jnp.einsum('nchw,wv->nchv', p, bh)
        return jnp.einsum('ij,ncjw->nciw', bv, p)

    xf = x.astype(jnp.float32)
    yf = y.astype(jnp.float32)
    ux, uy = blur(xf), blur(yf)
    vx = blur(xf * xf) - ux * ux
    vy = blur(yf * yf) - uy * uy
    vxy = blur(xf * yf) - ux * uy
    c1, c2 = 0.01 ** 2, 0.03 ** 2
    ssim = ((2 * ux * uy + c1) * (2 * vxy + c2)) / ((ux * ux + uy * uy + c1) * (vx + vy + c2))
    return 1.0 - jnp.mean(ssim)


if __name__ == "__main__":
    key = jax.random.PRNGKey(0)
    kx, ky = jax.random.split(key)
    N, C, H, W = 2, 4, 16, 16
    x = jax.random.uniform(kx, (N, C, H, W), dtype=jnp.float32)
    # y is a noisy version of x so SSIM is meaningful (between 0 and 1).
    y = jnp.clip(x + 0.05 * jax.random.normal(ky, (N, C, H, W), dtype=jnp.float32), 0.0, 1.0)

    loss = jax.jit(ssim_loss)(x, y)
    jax.block_until_ready(loss)

    ref = _ssim_loss_reference(x, y)
    jax.block_until_ready(ref)
    assert bool(jnp.isfinite(loss)), "non-finite loss"
    assert abs(float(loss) - float(ref)) < 2e-2, (float(loss), float(ref))

    print("KERNEL_OK")
</pallas_src>

<mosaic_0001>
module attributes {stable_mosaic.version = 11 : i64} {
  func.func @kernel(%arg0: i32, %arg1: memref<128x128xf32, #tpu.memory_space<vmem>>, %arg2: memref<80x80xf32, #tpu.memory_space<vmem>>, %arg3: memref<128x16xf32, #tpu.memory_space<vmem>>, %arg4: memref<128x16xf32, #tpu.memory_space<vmem>>, %arg5: memref<128x1xf32, #tpu.memory_space<vmem>>) attributes {dimension_semantics = [#tpu.dimension_semantics<parallel>], iteration_bounds = array<i64: 1>, scalar_prefetch = 0 : i64, scratch_operands = 0 : i64, tpu.core_type = #tpu.core_type<tc>, window_params = [{pipeline_mode = #tpu.pipeline_mode<synchronous>, transform_indices = @transform_0, window_bounds = array<i64: 128, 128>}, {pipeline_mode = #tpu.pipeline_mode<synchronous>, transform_indices = @transform_1, window_bounds = array<i64: 80, 80>}, {transform_indices = @transform_2, window_bounds = array<i64: 128, 16>}, {transform_indices = @transform_3, window_bounds = array<i64: 128, 16>}, {transform_indices = @transform_4, window_bounds = array<i64: 128, 1>}]} {
    %c0 = arith.constant 0 : index
    %c0_0 = arith.constant 0 : index
    %0 = vector.load %arg3[%c0, %c0_0] : memref<128x16xf32, #tpu.memory_space<vmem>>, vector<128x16xf32>
    %c0_1 = arith.constant 0 : index
    %c0_2 = arith.constant 0 : index
    %1 = vector.load %arg4[%c0_1, %c0_2] : memref<128x16xf32, #tpu.memory_space<vmem>>, vector<128x16xf32>
    %2 = arith.mulf %0, %0 : vector<128x16xf32>
    %3 = arith.mulf %1, %1 : vector<128x16xf32>
    %4 = arith.mulf %0, %1 : vector<128x16xf32>
    %5 = tpu.concatenate %0, %1, %2, %3, %4 in 1 : vector<128x16xf32>, vector<128x16xf32>, vector<128x16xf32>, vector<128x16xf32>, vector<128x16xf32> -> vector<128x80xf32>
    %c0_3 = arith.constant 0 : index
    %c0_4 = arith.constant 0 : index
    %6 = vector.load %arg2[%c0_3, %c0_4] : memref<80x80xf32, #tpu.memory_space<vmem>>, vector<80x80xf32>
    %cst = arith.constant dense<0.000000e+00> : vector<128x80xf32>
    %7 = tpu.matmul %5, %6, %cst {dimension_numbers = #tpu.dot_dimension_numbers<[1], [0], [0], [1], [0, 0, 1, 1], [], []>} : vector<128x80xf32>, vector<80x80xf32>, vector<128x80xf32> -> vector<128x80xf32>
    %c0_5 = arith.constant 0 : index
    %c0_6 = arith.constant 0 : index
    %8 = vector.load %arg1[%c0_5, %c0_6] : memref<128x128xf32, #tpu.memory_space<vmem>>, vector<128x128xf32>
    %cst_7 = arith.constant dense<0.000000e+00> : vector<128x80xf32>
    %9 = tpu.matmul %8, %7, %cst_7 {dimension_numbers = #tpu.dot_dimension_numbers<[1], [0], [0], [1], [0, 0, 1, 1], [], []>} : vector<128x128xf32>, vector<128x80xf32>, vector<128x80xf32> -> vector<128x80xf32>
    %10 = vector.extract_strided_slice %9 {offsets = [0, 0], sizes = [128, 16], strides = [1, 1]} : vector<128x80xf32> to vector<128x16xf32>
    %11 = vector.extract_strided_slice %9 {offsets = [0, 16], sizes = [128, 16], strides = [1, 1]} : vector<128x80xf32> to vector<128x16xf32>
    %12 = arith.mulf %10, %10 : vector<128x16xf32>
    %13 = arith.mulf %11, %11 : vector<128x16xf32>
    %14 = arith.mulf %10, %11 : vector<128x16xf32>
    %15 = vector.extract_strided_slice %9 {offsets = [0, 32], sizes = [128, 16], strides = [1, 1]} : vector<128x80xf32> to vector<128x16xf32>
    %16 = arith.subf %15, %12 : vector<128x16xf32>
    %17 = vector.extract_strided_slice %9 {offsets = [0, 48], sizes = [128, 16], strides = [1, 1]} : vector<128x80xf32> to vector<128x16xf32>
    %18 = arith.subf %17, %13 : vector<128x16xf32>
    %19 = vector.extract_strided_slice %9 {offsets = [0, 64], sizes = [128, 16], strides = [1, 1]} : vector<128x80xf32> to vector<128x16xf32>
    %20 = arith.subf %19, %14 : vector<128x16xf32>
    %cst_8 = arith.constant 2.000000e+00 : f32
    %21 = vector.broadcast %cst_8 : f32 to vector<128x16xf32>
    %22 = arith.mulf %21, %14 : vector<128x16xf32>
    %cst_9 = arith.constant 9.99999974E-5 : f32
    %23 = vector.broadcast %cst_9 : f32 to vector<128x16xf32>
    %24 = arith.addf %22, %23 : vector<128x16xf32>
    %cst_10 = arith.constant 2.000000e+00 : f32
    %25 = vector.broadcast %cst_10 : f32 to vector<128x16xf32>
    %26 = arith.mulf %25, %20 : vector<128x16xf32>
    %cst_11 = arith.constant 8.99999984E-4 : f32
    %27 = vector.broadcast %cst_11 : f32 to vector<128x16xf32>
    %28 = arith.addf %26, %27 : vector<128x16xf32>
    %29 = arith.mulf %24, %28 : vector<128x16xf32>
    %30 = arith.addf %12, %13 : vector<128x16xf32>
    %cst_12 = arith.constant 9.99999974E-5 : f32
    %31 = vector.broadcast %cst_12 : f32 to vector<128x16xf32>
    %32 = arith.addf %30, %31 : vector<128x16xf32>
    %33 = arith.addf %16, %18 : vector<128x16xf32>
    %cst_13 = arith.constant 8.99999984E-4 : f32
    %34 = vector.broadcast %cst_13 : f32 to vector<128x16xf32>
    %35 = arith.addf %33, %34 : vector<128x16xf32>
    %36 = arith.mulf %32, %35 : vector<128x16xf32>
    %37 = tpu.reciprocal %36 {approx = true} : vector<128x16xf32> -> vector<128x16xf32>
    %38 = arith.mulf %29, %37 : vector<128x16xf32>
    %cst_14 = arith.constant dense<0.000000e+00> : vector<128xf32>
    %39 = vector.multi_reduction <add>, %38, %cst_14 [1] : vector<128x16xf32> to vector<128xf32>
    %40 = vector.shape_cast %39 : vector<128xf32> to vector<128x1xf32>
    %c0_15 = arith.constant 0 : index
    %c0_16 = arith.constant 0 : index
    %41 = vector.load %arg5[%c0_15, %c0_16] : memref<128x1xf32, #tpu.memory_space<vmem>>, vector<128x1xf32>
    tpu.vector_store %arg5[%c0_15, %c0_16], %40 {strides = array<i32>} : memref<128x1xf32, #tpu.memory_space<vmem>>, vector<128x1xf32>,
    return
  }
  func.func @transform_0(%arg0: i32) -> (i32, i32) {
    %c0_i32 = arith.constant 0 : i32
    %c0_i32_0 = arith.constant 0 : i32
    %c0_i32_1 = arith.constant 0 : i32
    return %c0_i32, %c0_i32_0 : i32, i32
  }
  func.func @transform_1(%arg0: i32) -> (i32, i32) {
    %c0_i32 = arith.constant 0 : i32
    %c0_i32_0 = arith.constant 0 : i32
    %c0_i32_1 = arith.constant 0 : i32
    return %c0_i32, %c0_i32_0 : i32, i32
  }
  func.func @transform_2(%arg0: i32) -> (i32, i32) {
    %c0_i32 = arith.constant 0 : i32
    %c0_i32_0 = arith.constant 0 : i32
    return %arg0, %c0_i32 : i32, i32
  }
  func.func @transform_3(%arg0: i32) -> (i32, i32) {
    %c0_i32 = arith.constant 0 : i32
    %c0_i32_0 = arith.constant 0 : i32
    return %arg0, %c0_i32 : i32, i32
  }
  func.func @transform_4(%arg0: i32) -> (i32, i32) {
    %c0_i32 = arith.constant 0 : i32
    %c0_i32_0 = arith.constant 0 : i32
    return %arg0, %c0_i32 : i32, i32
  }
}

</mosaic_0001>

<bundles_post_ra>
// kernel: ssim_loss.1
= control target key start
LH: loop header
LB: loop body
LE: loop exit
PB: predicated region body
PF: predicated region fallthrough
CT: control target
= control target key end

     0   :  { %9 = vsyncpa [#allocation3], 0  ;;  %s2529_s0 = inlined_call_operand.hbm [shape: f32[128,128], index: 0, kind: input, shape index: {}]   ;;  %s2530_s1 = inlined_call_operand.hbm [shape: f32[80,80], index: 1, kind: input, shape index: {}]   ;;  %s2531_s2 = inlined_call_operand.hbm [shape: f32[128,16], index: 2, kind: input, shape index: {}]   ;;  %s2532_s3 = inlined_call_operand.hbm [shape: f32[128,16], index: 3, kind: input, shape index: {}]   ;;  %s2533_s4 = inlined_call_operand.vmem [shape: f32[128,1], index: 4, kind: output, shape index: {}]  }
   0x1   :  { %10 = vsyncpa [#allocation5], 0 }
   0x2   :  { %11 = vsyncpa [#allocation8], 0  ;;  %s29_s17 = sshll.u32 %s2530_s1, 4  ;;  %s1653_s18 = smov [#allocation4]   ;;  %s30_s17 = int_to_ptr.hbm [resolvable:$true] %s29_s17 }
   0x3   :  { %s31_s19 = sshll.u32 %s1653_s18, 4  ;;  %s16_s22 = sshll.u32 %s2529_s0, 4  ;;  %s32_s19 = int_to_ptr.vmem [resolvable:$true] %s31_s19  ;;  %s17_s22 = int_to_ptr.hbm [resolvable:$true] %s16_s22 }
   0x4   :  { %s1654_s23 = smov 128   ;;  %s1655_s24 = smov 8  }
   0x5   :  { %37 = dma.hbm_to_vmem [thread:$0]  %s30_s17, 1280, %s32_s19, [#allocation5], %s1654_s23, %s1654_s23, %s1655_s24  }
   0x6   :  { %s1656_s25 = smov [#allocation2]   ;;  %s42_s29 = sshll.u32 %s2531_s2, 4  ;;  %s43_s29 = int_to_ptr.hbm [resolvable:$true] %s42_s29 }
   0x7   :  { %s18_s26 = sshll.u32 %s1656_s25, 4  ;;  %s55_s5 = sshll.u32 %s2532_s3, 4  ;;  %s19_s26 = int_to_ptr.vmem [resolvable:$true] %s18_s26  ;;  %s56_s5 = int_to_ptr.hbm [resolvable:$true] %s55_s5 }
   0x8   :  { %24 = dma.hbm_to_vmem [thread:$0]  %s17_s22, 2048, %s19_s26, [#allocation3], %s1654_s23, %s1654_s23, %s1655_s24  }
   0x9   :  { %s1657_s6 = smov [#allocation6]   ;;  %s1658_s0 = smov [#allocation7]  }
   0xa   :  { %s44_s7 = sshll.u32 %s1657_s6, 4  ;;  %s57_s8 = sshll.u32 %s1658_s0, 4  ;;  %s45_s7 = int_to_ptr.vmem [resolvable:$true] %s44_s7  ;;  %s58_s8 = int_to_ptr.vmem [resolvable:$true] %s57_s8 }
   0xb   :  { %50 = dma.hbm_to_vmem [thread:$0]  %s43_s29, 2048, %s45_s7, [#allocation5], %s1654_s23, %s1654_s23, %s1655_s24  }
   0xc   :  { %63 = dma.hbm_to_vmem [thread:$0]  %s56_s5, 2048, %s58_s8, [#allocation8], %s1654_s23, %s1654_s23, %s1655_s24  }
   0xd   :  { %1647 = dma.done.wait [#allocation3], 2048  }
   0xe   :  { %1648 = vsyncadd [#allocation3], 4294965248 }
   0xf   :  { %1649 = dma.done.wait [#allocation5], 3328  }
  0x10   :  { %1650 = vsyncadd [#allocation5], 4294963968 }
  0x11   :  { %1651 = dma.done.wait [#allocation8], 2048  }
  0x12   :  { %1652 = vsyncadd [#allocation8], 4294965248  ;;  %v105_v0 = vld [vmem:[#allocation7 + $0x48] sm:$0xff]  ;;  %s1659_s2 = smov 16   ;;  %v96_v2 = vld [vmem:[#allocation7] sm:$0xff]  ;;  %s1660_s3 = smov 48  }
  0x13   :  { %194 = vrot.lane.b32.xlu0 %v105_v0, %s1659_s2  ;;  %v137_v1 = vmul.f32 %v105_v0, %v105_v0  ;;  %v1703_v3 = vld [vmem:[#allocation6 + $0x48] sm:$0xff]  ;;  %176 = vrot.lane.b32.xlu2 %v96_v2, %s1659_s2  ;;  %v1709_v5 = vld [vmem:[#allocation6] sm:$0xff]  ;;  %s1661_s9 = smov 32   ;;  %s1662_s10 = smov 64   ;;  %v128_v8 = vmul.f32 %v96_v2, %v96_v2  ;;  %v106_v10 = vld [vmem:[#allocation7 + $0x50] sm:$0xff]  ;;  %vm416_vm0 = vcmask 130048  }
  0x14   :  { %v121_v4 = vmul.f32 %v1703_v3, %v1703_v3  ;;  %v112_v6 = vmul.f32 %v1709_v5, %v1709_v5  ;;  %v153_v7 = vmul.f32 %v105_v0, %v1703_v3  ;;  %v144_v9 = vmul.f32 %v96_v2, %v1709_v5  ;;  %v1719_v11 = vld [vmem:[#allocation6 + $0x50] sm:$0xff]  ;;  %v1729_v15 = vld [vmem:[#allocation6 + $0x8] sm:$0xff]  ;;  %v1737_v20 = vld [vmem:[#allocation6 + $0x58] sm:$0xff]  ;;  %s1663_s11 = smov 112   ;;  %s1664_s12 = smov 96  }
  0x15   :  { %322 = vrot.lane.b32.xlu1 %v137_v1, %s1660_s3  ;;  %v122_v12 = vmul.f32 %v1719_v11, %v1719_v11  ;;  %v154_v13 = vmul.f32 %v106_v10, %v1719_v11  ;;  %v138_v14 = vmul.f32 %v106_v10, %v106_v10  ;;  %v97_v16 = vld [vmem:[#allocation7 + $0x8] sm:$0xff]  ;;  %v113_v18 = vmul.f32 %v1729_v15, %v1729_v15  ;;  %v107_v22 = vld [vmem:[#allocation7 + $0x58] sm:$0xff]  ;;  %v98_v25 = vld [vmem:[#allocation7 + $0x10] sm:$0xff] }
  0x16   :  { %v129_v17 = vmul.f32 %v97_v16, %v97_v16  ;;  %v145_v19 = vmul.f32 %v97_v16, %v1729_v15  ;;  %v123_v21 = vmul.f32 %v1737_v20, %v1737_v20  ;;  %v139_v23 = vmul.f32 %v107_v22, %v107_v22  ;;  %v1746_v26 = vld [vmem:[#allocation6 + $0x10] sm:$0xff]  ;;  %v1756_v30 = vld [vmem:[#allocation6 + $0x60] sm:$0xff]  ;;  %v1764_v35 = vld [vmem:[#allocation6 + $0x18] sm:$0xff] }
  0x17   :  { %v155_v24 = vmul.f32 %v107_v22, %v1737_v20  ;;  %v114_v27 = vmul.f32 %v1746_v26, %v1746_v26  ;;  %v146_v28 = vmul.f32 %v98_v25, %v1746_v26  ;;  %v130_v29 = vmul.f32 %v98_v25, %v98_v25  ;;  %v108_v31 = vld [vmem:[#allocation7 + $0x60] sm:$0xff]  ;;  %v99_v37 = vld [vmem:[#allocation7 + $0x18] sm:$0xff]  ;;  %v492_v39 = vld [vmem:[#allocation4 + $0x40] sm:$0xff] }
  0x18   :  { %v140_v32 = vmul.f32 %v108_v31, %v108_v31  ;;  %v124_v33 = vmul.f32 %v1756_v30, %v1756_v30  ;;  %v156_v34 = vmul.f32 %v108_v31, %v1756_v30  ;;  %v115_v36 = vmul.f32 %v1764_v35, %v1764_v35  ;;  %v493_v38 = vld [vmem:[#allocation4 + $0x48] sm:$0xff]  ;;  %v491_v41 = vld [vmem:[#allocation4 + $0x38] sm:$0xff]  ;;  %v490_v44 = vld [vmem:[#allocation4 + $0x30] sm:$0xff] }
  0x19   :  { %1465 = vmatpush.msra.mxu3 %v493_v38  ;;  %549 = vmatpush.msra.mxu0 %v493_v38  ;;  %v131_v40 = vmul.f32 %v99_v37, %v99_v37  ;;  %v147_v42 = vmul.f32 %v99_v37, %v1764_v35  ;;  %v109_v43 = vld [vmem:[#allocation7 + $0x68] sm:$0xff]  ;;  %v489_v46 = vld [vmem:[#allocation4 + $0x28] sm:$0xff]  ;;  %v488_v48 = vld [vmem:[#allocation4 + $0x20] sm:$0xff]  ;;  %vm433_vm1 = vcmask 261120   ;;  %vm450_vm2 = vcmask 392192  }
  0x1a   :  { %v1773_v45 = vld [vmem:[#allocation6 + $0x68] sm:$0xff]  ;;  %v141_v51 = vmul.f32 %v109_v43, %v109_v43  ;;  %v486_v52 = vld [vmem:[#allocation4 + $0x10] sm:$0xff]  ;;  %v485_v53 = vld [vmem:[#allocation4 + $0x8] sm:$0xff]  ;;  %vm467_vm3 = vcmask 523264   ;;  %vm494_vm4 = vcmask 654336   ;;  %vm1425_vm5 = vcmask 7168  }
  0x1b   :  { %258 = vrot.lane.b32.xlu0 %v121_v4, %s1661_s9  ;;  %240 = vrot.lane.b32.xlu2 %v112_v6, %s1661_s9  ;;  %v125_v47 = vmul.f32 %v1773_v45, %v1773_v45  ;;  %v487_v49 = vld [vmem:[#allocation4 + $0x18] sm:$0xff]  ;;  %v157_v50 = vmul.f32 %v109_v43, %v1773_v45  ;;  %v1783_v54 = vld [vmem:[#allocation6 + $0x20] sm:$0xff]  ;;  %v484_v57 = vld [vmem:[#allocation4] sm:$0xff] }
  0x1c   :  { %1466 = vmatpush.msra.mxu3 %v492_v39  ;;  %550 = vmatpush.msra.mxu0 %v492_v39  ;;  %v100_v56 = vld [vmem:[#allocation7 + $0x20] sm:$0xff]  ;;  %v116_v59 = vmul.f32 %v1783_v54, %v1783_v54  ;;  %v1791_v62 = vld [vmem:[#allocation6 + $0x70] sm:$0xff]  ;;  %v101_v6 = vld [vmem:[#allocation7 + $0x28] sm:$0xff] }
  0x1d   :  { %386 = vrot.lane.b32.xlu1 %v153_v7, %s1662_s10  ;;  %v132_v58 = vmul.f32 %v100_v56, %v100_v56  ;;  %v148_v61 = vmul.f32 %v100_v56, %v1783_v54  ;;  %v126_v63 = vmul.f32 %v1791_v62, %v1791_v62  ;;  %v110_v0 = vld [vmem:[#allocation7 + $0x70] sm:$0xff]  ;;  %v1800_v7 = vld [vmem:[#allocation6 + $0x28] sm:$0xff] }
  0x1e   :  { %1467 = vmatpush.msra.mxu3 %v491_v41  ;;  %551 = vmatpush.msra.mxu0 %v491_v41  ;;  %v142_v2 = vmul.f32 %v110_v0, %v110_v0  ;;  %v158_v4 = vmul.f32 %v110_v0, %v1791_v62  ;;  %v102_v39 = vld [vmem:[#allocation7 + $0x30] sm:$0xff] }
  0x20   :  { %1468 = vmatpush.msra.mxu3 %v490_v44  ;;  %552 = vmatpush.msra.mxu0 %v490_v44 }
  0x22   :  { %1469 = vmatpush.msra.mxu3 %v489_v46  ;;  %553 = vmatpush.msra.mxu0 %v489_v46  ;;  %v134_v46 = vmul.f32 %v102_v39, %v102_v39 }
  0x23   :  { %304 = vrot.lane.b32.xlu0 %v128_v8, %s1660_s3  ;;  %196 = vrot.lane.b32.xlu2 %v106_v10, %s1659_s2 }
  0x24   :  { %1470 = vmatpush.msra.mxu3 %v488_v48  ;;  %554 = vmatpush.msra.mxu0 %v488_v48 }
  0x25   :  { %368 = vrot.lane.b32.xlu1 %v144_v9, %s1662_s10 }
  0x26   :  { %1471 = vmatpush.msra.mxu3 %v487_v49  ;;  %555 = vmatpush.msra.mxu0 %v487_v49 }
  0x28   :  { %1472 = vmatpush.msra.mxu3 %v486_v52  ;;  %556 = vmatpush.msra.mxu0 %v486_v52 }
  0x2a   :  { %1473 = vmatpush.msra.mxu3 %v485_v53  ;;  %557 = vmatpush.msra.mxu0 %v485_v53 }
  0x2b   :  { %260 = vrot.lane.b32.xlu0 %v122_v12, %s1661_s9  ;;  %388 = vrot.lane.b32.xlu2 %v154_v13, %s1662_s10  ;;  %v117_v12 = vmul.f32 %v1800_v7, %v1800_v7  ;;  %v149_v13 = vmul.f32 %v101_v6, %v1800_v7 }
  0x2c   :  { %1474 = vmatpush.msra.mxu3 %v484_v57  ;;  %558 = vmatpush.msra.mxu0 %v484_v57 }
  0x2d   :  { %324 = vrot.lane.b32.xlu1 %v138_v14, %s1660_s3  ;;  %v133_v14 = vmul.f32 %v101_v6, %v101_v6 }
  0x33   :  { %178 = vrot.lane.b32.xlu0 %v97_v16, %s1659_s2  ;;  %306 = vrot.lane.b32.xlu2 %v129_v17, %s1660_s3 }
  0x35   :  { %242 = vrot.lane.b32.xlu1 %v113_v18, %s1661_s9 }
  0x3b   :  { %370 = vrot.lane.b32.xlu0 %v145_v19, %s1662_s10  ;;  %262 = vrot.lane.b32.xlu2 %v123_v21, %s1661_s9  ;;  %v1813_v19 = vld [vmem:[#allocation6 + $0x78] sm:$0xff] }
  0x3d   :  { %198 = vrot.lane.b32.xlu1 %v107_v22, %s1659_s2 }
  0x43   :  { %326 = vrot.lane.b32.xlu0 %v139_v23, %s1660_s3  ;;  %180 = vrot.lane.b32.xlu2 %v98_v25, %s1659_s2 }
  0x45   :  { %390 = vrot.lane.b32.xlu1 %v155_v24, %s1662_s10  ;;  %v111_v24 = vld [vmem:[#allocation7 + $0x78] sm:$0xff] }
  0x4b   :  { %244 = vrot.lane.b32.xlu0 %v114_v27, %s1661_s9  ;;  %372 = vrot.lane.b32.xlu2 %v146_v28, %s1662_s10  ;;  %v143_v27 = vmul.f32 %v111_v24, %v111_v24 }
  0x4d   :  { %308 = vrot.lane.b32.xlu1 %v130_v29, %s1660_s3 }
  0x53   :  { %200 = vrot.lane.b32.xlu0 %v108_v31, %s1659_s2  ;;  %328 = vrot.lane.b32.xlu2 %v140_v32, %s1660_s3 }
  0x55   :  { %264 = vrot.lane.b32.xlu1 %v124_v33, %s1661_s9 }
  0x5b   :  { %392 = vrot.lane.b32.xlu0 %v156_v34, %s1662_s10  ;;  %246 = vrot.lane.b32.xlu2 %v115_v36, %s1661_s9  ;;  %v159_v36 = vmul.f32 %v111_v24, %v1813_v19 }
  0x5d   :  { %182 = vrot.lane.b32.xlu1 %v99_v37, %s1659_s2  ;;  %v1828_v37 = vld [vmem:[#allocation6 + $0x30] sm:$0xff] }
  0x5e   :  { %v150_v49 = vmul.f32 %v102_v39, %v1828_v37 }
  0x63   :  { %310 = vrot.lane.b32.xlu0 %v131_v40, %s1660_s3  ;;  %202 = vrot.lane.b32.xlu2 %v109_v43, %s1659_s2 }
  0x65   :  { %374 = vrot.lane.b32.xlu1 %v147_v42, %s1662_s10 }
  0x6b   :  { %266 = vrot.lane.b32.xlu0 %v125_v47, %s1661_s9  ;;  %394 = vrot.lane.b32.xlu2 %v157_v50, %s1662_s10  ;;  %v1845_v50 = vld [vmem:[#allocation6 + $0x38] sm:$0xff] }
  0x6d   :  { %330 = vrot.lane.b32.xlu1 %v141_v51, %s1660_s3  ;;  %v177_v55 = vpop.permute.xlu2 %176 }
  0x6e   :  { %v417_v28 = vsel %vm416_vm0, %v1709_v5, %v177_v55  ;;  %v118_v5 = vmul.f32 %v1828_v37, %v1828_v37 }
  0x73   :  { %184 = vrot.lane.b32.xlu0 %v100_v56, %s1659_s2  ;;  %312 = vrot.lane.b32.xlu2 %v132_v58, %s1660_s3  ;;  %v119_v56 = vmul.f32 %v1845_v50, %v1845_v50 }
  0x75   :  { %248 = vrot.lane.b32.xlu1 %v116_v59, %s1661_s9  ;;  %v241_v60 = vpop.permute.xlu2 %240 }
  0x76   :  { %v434_v29 = vsel %vm433_vm1, %v417_v28, %v241_v60 }
  0x7b   :  { %376 = vrot.lane.b32.xlu0 %v148_v61, %s1662_s10  ;;  %268 = vrot.lane.b32.xlu2 %v126_v63, %s1661_s9  ;;  %v1860_v63 = vld [vmem:[#allocation6 + $0x40] sm:$0xff] }
  0x7d   :  { %204 = vrot.lane.b32.xlu1 %v110_v0, %s1659_s2  ;;  %v197_v1 = vpop.permute.xlu2 %196 }
  0x7e   :  { %v427_v40 = vsel %vm416_vm0, %v1719_v11, %v197_v1  ;;  %v103_v11 = vld [vmem:[#allocation7 + $0x38] sm:$0xff]  ;;  %v104_v1 = vld [vmem:[#allocation7 + $0x40] sm:$0xff] }
  0x7f   :  { %v151_v57 = vmul.f32 %v103_v11, %v1845_v50  ;;  %v135_v58 = vmul.f32 %v103_v11, %v103_v11 }
  0x83   :  { %332 = vrot.lane.b32.xlu0 %v142_v2, %s1660_s3  ;;  %186 = vrot.lane.b32.xlu2 %v101_v6, %s1659_s2  ;;  %v136_v6 = vmul.f32 %v104_v1, %v104_v1 }
  0x85   :  { %v195_v8 = vpop.permute.xlu0 %194  ;;  %396 = vrot.lane.b32.xlu1 %v158_v4, %s1662_s10  ;;  %v389_v9 = vpop.permute.xlu2 %388 }
  0x86   :  { %v426_v16 = vsel %vm416_vm0, %v1703_v3, %v195_v8  ;;  %v127_v3 = vmul.f32 %v1813_v19, %v1813_v19  ;;  %v120_v8 = vmul.f32 %v1860_v63, %v1860_v63 }
  0x87   :  { %v323_v10 = vpop.permute.xlu1 %322 }
  0x8b   :  { %250 = vrot.lane.b32.xlu0 %v117_v12, %s1661_s9  ;;  %378 = vrot.lane.b32.xlu2 %v149_v13, %s1662_s10 }
  0x8d   :  { %v259_v17 = vpop.permute.xlu0 %258  ;;  %314 = vrot.lane.b32.xlu1 %v133_v14, %s1660_s3  ;;  %v307_v21 = vpop.permute.xlu2 %306  ;;  %v152_v14 = vmul.f32 %v104_v1, %v1860_v63 }
  0x8e   :  { %v443_v18 = vsel %vm433_vm1, %v426_v16, %v259_v17 }
  0x8f   :  { %v387_v22 = vpop.permute.xlu1 %386  ;;  %v460_v23 = vsel %vm450_vm2, %v443_v18, %v323_v10 }
  0x90   :  { %v477_v25 = vsel %vm467_vm3, %v460_v23, %v387_v22 }
  0x91   :  { %1458 = vmatmul.msk.f32.vlgmr.msra.gmra.mxu3 %vm494_vm4, %v477_v25 }
  0x93   :  { %206 = vrot.lane.b32.xlu0 %v111_v24, %s1659_s2  ;;  %334 = vrot.lane.b32.xlu2 %v143_v27, %s1660_s3 }
  0x95   :  { %v305_v31 = vpop.permute.xlu0 %304  ;;  %270 = vrot.lane.b32.xlu1 %v127_v3, %s1661_s9  ;;  %v263_v33 = vpop.permute.xlu2 %262 }
  0x96   :  { %v451_v32 = vsel %vm450_vm2, %v434_v29, %v305_v31 }
  0x97   :  { %v369_v34 = vpop.permute.xlu1 %368 }
  0x98   :  { %v468_v38 = vsel %vm467_vm3, %v451_v32, %v369_v34 }
  0x99   :  { %1449 = vmatmul.msk.f32.vlgmr.msra.gmra.mxu0 %vm494_vm4, %v468_v38 }
  0x9b   :  { %398 = vrot.lane.b32.xlu0 %v159_v36, %s1662_s10  ;;  %252 = vrot.lane.b32.xlu2 %v118_v5, %s1661_s9 }
  0x9d   :  { %v261_v41 = vpop.permute.xlu0 %260  ;;  %188 = vrot.lane.b32.xlu1 %v102_v39, %s1659_s2  ;;  %v181_v43 = vpop.permute.xlu2 %180 }
  0x9e   :  { %v444_v42 = vsel %vm433_vm1, %v427_v40, %v261_v41  ;;  %v419_v17 = vsel %vm416_vm0, %v1746_v26, %v181_v43 }
  0x9f   :  { %v325_v44 = vpop.permute.xlu1 %324 }
  0xa0   :  { %v461_v47 = vsel %vm450_vm2, %v444_v42, %v325_v44 }
  0xa1   :  { %v478_v48 = vsel %vm467_vm3, %v461_v47, %v389_v9 }
  0xa2   :  { %1459 = vmatmul.msk.f32.gmra.mxu3 %vm494_vm4, %v478_v48 }
  0xa3   :  { %316 = vrot.lane.b32.xlu0 %v134_v46, %s1660_s3  ;;  %190 = vrot.lane.b32.xlu2 %v103_v11, %s1659_s2 }
  0xa5   :  { %v179_v51 = vpop.permute.xlu0 %178  ;;  %380 = vrot.lane.b32.xlu1 %v150_v49, %s1662_s10  ;;  %v373_v52 = vpop.permute.xlu2 %372 }
  0xa6   :  { %v418_v53 = vsel %vm416_vm0, %v1729_v15, %v179_v51 }
  0xa7   :  { %v243_v55 = vpop.permute.xlu1 %242 }
  0xa8   :  { %v435_v59 = vsel %vm433_vm1, %v418_v53, %v243_v55 }
  0xa9   :  { %v452_v60 = vsel %vm450_vm2, %v435_v59, %v307_v21 }
  0xab   :  { %254 = vrot.lane.b32.xlu0 %v119_v56, %s1661_s9  ;;  %382 = vrot.lane.b32.xlu2 %v151_v57, %s1662_s10 }
  0xad   :  { %v371_v61 = vpop.permute.xlu0 %370  ;;  %318 = vrot.lane.b32.xlu1 %v135_v58, %s1660_s3  ;;  %v329_v4 = vpop.permute.xlu2 %328 }
  0xae   :  { %v469_v15 = vsel %vm467_vm3, %v452_v60, %v371_v61 }
  0xaf   :  { %v199_v0 = vpop.permute.xlu1 %198  ;;  %1450 = vmatmul.msk.f32.gmra.mxu0 %vm494_vm4, %v469_v15 }
  0xb0   :  { %v428_v2 = vsel %vm416_vm0, %v1737_v20, %v199_v0 }
  0xb1   :  { %v445_v9 = vsel %vm433_vm1, %v428_v2, %v263_v33 }
  0xb3   :  { %192 = vrot.lane.b32.xlu0 %v104_v1, %s1659_s2  ;;  %320 = vrot.lane.b32.xlu2 %v136_v6, %s1660_s3 }
  0xb5   :  { %v327_v10 = vpop.permute.xlu0 %326  ;;  %256 = vrot.lane.b32.xlu1 %v120_v8, %s1661_s9  ;;  %v247_v16 = vpop.permute.xlu2 %246 }
  0xb6   :  { %v462_v12 = vsel %vm450_vm2, %v445_v9, %v327_v10 }
  0xb7   :  { %v391_v13 = vpop.permute.xlu1 %390 }
  0xb8   :  { %v479_v20 = vsel %vm467_vm3, %v462_v12, %v391_v13 }
  0xb9   :  { %1460 = vmatmul.msk.f32.gmra.mxu3 %vm494_vm4, %v479_v20 }
  0xbb   :  { %384 = vrot.lane.b32.xlu0 %v152_v14, %s1662_s10 }
  0xbd   :  { %v245_v18 = vpop.permute.xlu0 %244  ;;  %v203_v25 = vpop.permute.xlu2 %202 }
  0xbe   :  { %v436_v21 = vsel %vm433_vm1, %v419_v17, %v245_v18  ;;  %v430_v42 = vsel %vm416_vm0, %v1773_v45, %v203_v25 }
  0xbf   :  { %v309_v22 = vpop.permute.xlu1 %308 }
  0xc0   :  { %v453_v23 = vsel %vm450_vm2, %v436_v21, %v309_v22 }
  0xc1   :  { %v470_v24 = vsel %vm467_vm3, %v453_v23, %v373_v52 }
  0xc2   :  { %1451 = vmatmul.msk.f32.gmra.mxu0 %vm494_vm4, %v470_v24 }
  0xc5   :  { %v201_v27 = vpop.permute.xlu0 %200  ;;  %v395_v33 = vpop.permute.xlu2 %394 }
  0xc6   :  { %v429_v3 = vsel %vm416_vm0, %v1756_v30, %v201_v27 }
  0xc7   :  { %v265_v28 = vpop.permute.xlu1 %264 }
  0xc8   :  { %v446_v26 = vsel %vm433_vm1, %v429_v3, %v265_v28 }
  0xc9   :  { %v463_v29 = vsel %vm450_vm2, %v446_v26, %v329_v4 }
  0xcd   :  { %v393_v31 = vpop.permute.xlu0 %392  ;;  %v313_v41 = vpop.permute.xlu2 %312 }
  0xce   :  { %v480_v32 = vsel %vm467_vm3, %v463_v29, %v393_v31 }
  0xcf   :  { %v183_v34 = vpop.permute.xlu1 %182  ;;  %1461 = vmatmul.msk.f32.gmra.mxu3 %vm494_vm4, %v480_v32 }
  0xd0   :  { %v420_v36 = vsel %vm416_vm0, %v1764_v35, %v183_v34 }
  0xd1   :  { %v437_v38 = vsel %vm433_vm1, %v420_v36, %v247_v16 }
  0xd5   :  { %v311_v5 = vpop.permute.xlu0 %310  ;;  %v269_v48 = vpop.permute.xlu2 %268 }
  0xd6   :  { %v454_v30 = vsel %vm450_vm2, %v437_v38, %v311_v5 }
  0xd7   :  { %v375_v39 = vpop.permute.xlu1 %374 }
  0xd8   :  { %v471_v40 = vsel %vm467_vm3, %v454_v30, %v375_v39 }
  0xd9   :  { %1452 = vmatmul.msk.f32.gmra.mxu0 %vm494_vm4, %v471_v40 }
  0xdd   :  { %v267_v43 = vpop.permute.xlu0 %266  ;;  %v187_v53 = vpop.permute.xlu2 %186 }
  0xde   :  { %v447_v44 = vsel %vm433_vm1, %v430_v42, %v267_v43  ;;  %v422_v1 = vsel %vm416_vm0, %v1800_v7, %v187_v53 }
  0xdf   :  { %v331_v46 = vpop.permute.xlu1 %330 }
  0xe0   :  { %v464_v35 = vsel %vm450_vm2, %v447_v44, %v331_v46 }
  0xe1   :  { %v481_v47 = vsel %vm467_vm3, %v464_v35, %v395_v33 }
  0xe2   :  { %1462 = vmatmul.msk.f32.gmra.mxu3 %vm494_vm4, %v481_v47 }
  0xe5   :  { %v185_v49 = vpop.permute.xlu0 %184  ;;  %v379_v61 = vpop.permute.xlu2 %378 }
  0xe6   :  { %v421_v11 = vsel %vm416_vm0, %v1783_v54, %v185_v49 }
  0xe7   :  { %v249_v51 = vpop.permute.xlu1 %248 }
  0xe8   :  { %v438_v52 = vsel %vm433_vm1, %v421_v11, %v249_v51 }
  0xe9   :  { %v455_v45 = vsel %vm450_vm2, %v438_v52, %v313_v41 }
  0xed   :  { %v377_v55 = vpop.permute.xlu0 %376  ;;  %v335_v8 = vpop.permute.xlu2 %334 }
  0xee   :  { %v472_v56 = vsel %vm467_vm3, %v455_v45, %v377_v55  ;;  %v608_v55 = vld [vmem:[#allocation2] sm:$0xff] }
  0xef   :  { %v205_v57 = vpop.permute.xlu1 %204  ;;  %1453 = vmatmul.msk.f32.gmra.mxu0 %vm494_vm4, %v472_v56  ;;  %v615_v56 = vld [vmem:[#allocation2 + $0x38] sm:$0xff] }
  0xf0   :  { %v431_v58 = vsel %vm416_vm0, %v1791_v62, %v205_v57  ;;  %v623_v57 = vld [vmem:[#allocation2 + $0x78] sm:$0xff] }
  0xf1   :  { %v448_v59 = vsel %vm433_vm1, %v431_v58, %v269_v48  ;;  %v609_v58 = vld [vmem:[#allocation2 + $0x8] sm:$0xff] }
  0xf5   :  { %v333_v60 = vpop.permute.xlu0 %332  ;;  %v253_v20 = vpop.permute.xlu2 %252 }
  0xf6   :  { %v465_v54 = vsel %vm450_vm2, %v448_v59, %v333_v60  ;;  %v616_v59 = vld [vmem:[#allocation2 + $0x40] sm:$0xff]  ;;  %v610_v60 = vld [vmem:[#allocation2 + $0x10] sm:$0xff] }
  0xf7   :  { %v397_v15 = vpop.permute.xlu1 %396 }
  0xf8   :  { %v482_v0 = vsel %vm467_vm3, %v465_v54, %v397_v15  ;;  %v617_v54 = vld [vmem:[#allocation2 + $0x48] sm:$0xff]  ;;  %v618_v15 = vld [vmem:[#allocation2 + $0x50] sm:$0xff] }
  0xf9   :  { %1463 = vmatmul.msk.f32.gmra.mxu3 %vm494_vm4, %v482_v0  ;;  %v612_v0 = vld [vmem:[#allocation2 + $0x20] sm:$0xff] }
  0xfd   :  { %v251_v2 = vpop.permute.xlu0 %250  ;;  %v191_v23 = vpop.permute.xlu2 %190 }
  0xfe   :  { %v439_v4 = vsel %vm433_vm1, %v422_v1, %v251_v2  ;;  %v424_v3 = vsel %vm416_vm0, %v1845_v50, %v191_v23  ;;  %v619_v1 = vld [vmem:[#allocation2 + $0x58] sm:$0xff]  ;;  %v613_v2 = vld [vmem:[#allocation2 + $0x28] sm:$0xff] }
  0xff   :  { %v315_v6 = vpop.permute.xlu1 %314 }
 0x100   :  { %v456_v62 = vsel %vm450_vm2, %v439_v4, %v315_v6  ;;  %v620_v4 = vld [vmem:[#allocation2 + $0x60] sm:$0xff]  ;;  %v614_v6 = vld [vmem:[#allocation2 + $0x30] sm:$0xff] }
 0x101   :  { %v473_v9 = vsel %vm467_vm3, %v456_v62, %v379_v61  ;;  %v611_v61 = vld [vmem:[#allocation2 + $0x18] sm:$0xff]  ;;  %v621_v62 = vld [vmem:[#allocation2 + $0x68] sm:$0xff] }
 0x102   :  { %1454 = vmatmul.msk.f32.gmra.mxu0 %vm494_vm4, %v473_v9 }
 0x105   :  { %v207_v10 = vpop.permute.xlu0 %206  ;;  %v383_v29 = vpop.permute.xlu2 %382 }
 0x106   :  { %v432_v12 = vsel %vm416_vm0, %v1813_v19, %v207_v10 }
 0x107   :  { %v271_v13 = vpop.permute.xlu1 %270 }
 0x108   :  { %v449_v14 = vsel %vm433_vm1, %v432_v12, %v271_v13 }
 0x109   :  { %v466_v7 = vsel %vm450_vm2, %v449_v14, %v335_v8  ;;  %v622_v8 = vld [vmem:[#allocation2 + $0x70] sm:$0xff] }
 0x10d   :  { %v399_v16 = vpop.permute.xlu0 %398  ;;  %v321_v5 = vpop.permute.xlu2 %320 }
 0x10e   :  { %v483_v17 = vsel %vm467_vm3, %v466_v7, %v399_v16 }
 0x10f   :  { %v189_v18 = vpop.permute.xlu1 %188  ;;  %1464 = vmatmul.msk.f32.gmra.mxu3 %vm494_vm4, %v483_v17 }
 0x110   :  { %v423_v21 = vsel %vm416_vm0, %v1828_v37, %v189_v18 }
 0x111   :  { %v440_v22 = vsel %vm433_vm1, %v423_v21, %v253_v20 }
 0x114   :  { %v587_v40 = vpop.f32.mrf.mxu3 }
 0x115   :  { %v317_v24 = vpop.permute.xlu0 %316 }
 0x116   :  { %v457_v19 = vsel %vm450_vm2, %v440_v22, %v317_v24  ;;  %v1942_v41 = vpop.f32.mrf.mxu0 }
 0x117   :  { %v381_v25 = vpop.permute.xlu1 %380 }
 0x118   :  { %v474_v27 = vsel %vm467_vm3, %v457_v19, %v381_v25 }
 0x119   :  { %1455 = vmatmul.msk.f32.gmra.mxu0 %vm494_vm4, %v474_v27 }
 0x11d   :  { %v255_v28 = vpop.permute.xlu0 %254 }
 0x11e   :  { %v441_v26 = vsel %vm433_vm1, %v424_v3, %v255_v28 }
 0x11f   :  { %v319_v31 = vpop.permute.xlu1 %318 }
 0x120   :  { %v458_v37 = vsel %vm450_vm2, %v441_v26, %v319_v31 }
 0x121   :  { %v475_v32 = vsel %vm467_vm3, %v458_v37, %v383_v29 }
 0x122   :  { %1456 = vmatmul.msk.f32.gmra.mxu0 %vm494_vm4, %v475_v32 }
 0x125   :  { %v193_v33 = vpop.permute.xlu0 %192  ;;  %v590_v42 = vpop.f32.mrf.mxu3 }
 0x126   :  { %v425_v34 = vsel %vm416_vm0, %v1860_v63, %v193_v33 }
 0x127   :  { %v257_v36 = vpop.permute.xlu1 %256 }
 0x128   :  { %v442_v38 = vsel %vm433_vm1, %v425_v34, %v257_v36 }
 0x129   :  { %v459_v50 = vsel %vm450_vm2, %v442_v38, %v321_v5 }
 0x12c   :  { %v563_v43 = vpop.f32.mrf.mxu0 }
 0x12d   :  { %v385_v30 = vpop.permute.xlu0 %384 }
 0x12e   :  { %v476_v39 = vsel %vm467_vm3, %v459_v50, %v385_v30 }
 0x12f   :  { %1457 = vmatmul.msk.f32.gmra.mxu0 %vm494_vm4, %v476_v39 }
 0x13c   :  { %v593_v44 = vpop.f32.mrf.mxu3 }
 0x13f   :  { %v566_v46 = vpop.f32.mrf.mxu0 }
 0x152   :  { %v596_v35 = vpop.f32.mrf.mxu3 }
 0x156   :  { %v569_v63 = vpop.f32.mrf.mxu0 }
 0x165   :  { %v599_v47 = vpop.f32.mrf.mxu3 }
 0x16c   :  { %v572_v48 = vpop.f32.mrf.mxu0 }
 0x17c   :  { %v602_v49 = vpop.f32.mrf.mxu3 }
 0x17f   :  { %v575_v11 = vpop.f32.mrf.mxu0 }
 0x192   :  { %v605_v51 = vpop.f32.mrf.mxu3 }
 0x193   :  { %624 = vmatpush.msra.mxu1 %v605_v51  ;;  %1475 = vmatpush.msra.mxu2 %v605_v51 }
 0x194   :  { %1476 = vmatpush.msrb.mxu3 %v605_v51 }
 0x195   :  { %625 = vmatpush.msra.mxu1 %v602_v49  ;;  %1477 = vmatpush.msra.mxu2 %v602_v49 }
 0x196   :  { %1478 = vmatpush.msrb.mxu3 %v602_v49  ;;  %v578_v52 = vpop.f32.mrf.mxu0 }
 0x197   :  { %626 = vmatpush.msra.mxu1 %v599_v47  ;;  %1479 = vmatpush.msra.mxu2 %v599_v47 }
 0x198   :  { %1480 = vmatpush.msrb.mxu3 %v599_v47 }
 0x199   :  { %627 = vmatpush.msra.mxu1 %v596_v35  ;;  %1481 = vmatpush.msra.mxu2 %v596_v35 }
 0x19a   :  { %1482 = vmatpush.msrb.mxu3 %v596_v35 }
 0x19b   :  { %628 = vmatpush.msra.mxu1 %v593_v44  ;;  %1483 = vmatpush.msra.mxu2 %v593_v44 }
 0x19c   :  { %1484 = vmatpush.msrb.mxu3 %v593_v44 }
 0x19d   :  { %629 = vmatpush.msra.mxu1 %v590_v42  ;;  %1485 = vmatpush.msra.mxu2 %v590_v42 }
 0x19e   :  { %1486 = vmatpush.msrb.mxu3 %v590_v42 }
 0x19f   :  { %630 = vmatpush.msra.mxu1 %v587_v40  ;;  %1487 = vmatpush.msra.mxu2 %v587_v40  ;;  %v581_v53 = vpop.f32.mrf.mxu0 }
 0x1a0   :  { %1488 = vmatpush.msrb.mxu3 %v587_v40 }
 0x1ac   :  { %v584_v45 = vpop.f32.mrf.mxu0 }
 0x1ad   :  { %631 = vmatpush.msra.mxu1 %v584_v45  ;;  %1489 = vmatpush.msra.mxu2 %v584_v45 }
 0x1ae   :  { %1490 = vmatpush.msrb.mxu3 %v584_v45 }
 0x1af   :  { %632 = vmatpush.msra.mxu1 %v581_v53  ;;  %1491 = vmatpush.msra.mxu2 %v581_v53 }
 0x1b0   :  { %1492 = vmatpush.msrb.mxu3 %v581_v53 }
 0x1b1   :  { %633 = vmatpush.msra.mxu1 %v578_v52  ;;  %1493 = vmatpush.msra.mxu2 %v578_v52 }
 0x1b2   :  { %1494 = vmatpush.msrb.mxu3 %v578_v52 }
 0x1b3   :  { %634 = vmatpush.msra.mxu1 %v575_v11  ;;  %1495 = vmatpush.msra.mxu2 %v575_v11 }
 0x1b4   :  { %1496 = vmatpush.msrb.mxu3 %v575_v11 }
 0x1b5   :  { %635 = vmatpush.msra.mxu1 %v572_v48  ;;  %1497 = vmatpush.msra.mxu2 %v572_v48 }
 0x1b6   :  { %1498 = vmatpush.msrb.mxu3 %v572_v48 }
 0x1b7   :  { %636 = vmatpush.msra.mxu1 %v569_v63  ;;  %1499 = vmatpush.msra.mxu2 %v569_v63 }
 0x1b8   :  { %1500 = vmatpush.msrb.mxu3 %v569_v63 }
 0x1b9   :  { %637 = vmatpush.msra.mxu1 %v566_v46  ;;  %1501 = vmatpush.msra.mxu2 %v566_v46 }
 0x1ba   :  { %1502 = vmatpush.msrb.mxu3 %v566_v46 }
 0x1bb   :  { %638 = vmatpush.msra.mxu1 %v563_v43  ;;  %1503 = vmatpush.msra.mxu2 %v563_v43 }
 0x1bc   :  { %1504 = vmatpush.msrb.mxu3 %v563_v43 }
 0x1bd   :  { %639 = vmatpush.msra.mxu1 %v1942_v41  ;;  %1505 = vmatpush.msra.mxu2 %v1942_v41 }
 0x1be   :  { %1506 = vmatpush.msrb.mxu3 %v1942_v41  ;;  %640 = vmatmul.f32.vlgmr.msra.gmra.mxu1 %v608_v55 }
 0x1bf   :  { %661 = vmatmul.f32.vlgmr.msra.gmra.mxu2 %v615_v56  ;;  %685 = vmatmul.f32.vlgmr.msrb.gmra.mxu3 %v623_v57 }
 0x1c6   :  { %643 = vmatmul.f32.gmra.mxu1 %v609_v58 }
 0x1c7   :  { %664 = vmatmul.f32.gmra.mxu2 %v616_v59 }
 0x1ce   :  { %646 = vmatmul.f32.gmra.mxu1 %v610_v60 }
 0x1cf   :  { %667 = vmatmul.f32.gmra.mxu2 %v617_v54 }
 0x1d6   :  { %649 = vmatmul.f32.gmra.mxu1 %v611_v61 }
 0x1d7   :  { %670 = vmatmul.f32.gmra.mxu2 %v618_v15 }
 0x1de   :  { %652 = vmatmul.f32.gmra.mxu1 %v612_v0 }
 0x1df   :  { %673 = vmatmul.f32.gmra.mxu2 %v619_v1 }
 0x1e6   :  { %655 = vmatmul.f32.gmra.mxu1 %v613_v2 }
 0x1e7   :  { %676 = vmatmul.f32.gmra.mxu2 %v620_v4 }
 0x1ee   :  { %658 = vmatmul.f32.gmra.mxu1 %v614_v6 }
 0x1ef   :  { %679 = vmatmul.f32.gmra.mxu2 %v621_v62 }
 0x1f7   :  { %682 = vmatmul.f32.gmra.mxu2 %v622_v8 }
 0x23b   :  { %v1947_v9 = vpop.f32.mrf.mxu1 }
 0x23c   :  { %721 = vrot.lane.b32.xlu1 %v1947_v9, %s1663_s11  ;;  %v1953_v10 = vmul.f32 %v1947_v9, %v1947_v9 }
 0x23e   :  { %801 = vrot.lane.b32.xlu2 %v1953_v10, %s1661_s9 }
 0x242   :  { %v1957_v12 = vpop.f32.mrf.mxu2  ;;  %v1959_v13 = vpop.f32.mrf.mxu3 }
 0x243   :  { %v1963_v14 = vmul.f32 %v1957_v12, %v1957_v12  ;;  %v1977_v16 = vpop.f32.mrf.mxu1  ;;  %v2003_v22 = vmul.f32 %v1959_v13, %v1959_v13 }
 0x244   :  { %751 = vrot.lane.b32.xlu1 %v1959_v13, %s1663_s11  ;;  %v1987_v17 = vmul.f32 %v1977_v16, %v1977_v16 }
 0x245   :  { %815 = vrot.lane.b32.xlu0 %v1963_v14, %s1661_s9 }
 0x246   :  { %1089 = vrot.lane.b32.xlu2 %v1953_v10, %s1663_s11 }
 0x24a   :  { %v1971_v20 = vpop.f32.mrf.mxu2 }
 0x24b   :  { %v1975_v7 = vmul.f32 %v1971_v20, %v1971_v20  ;;  %v1995_v18 = vpop.f32.mrf.mxu1 }
 0x24c   :  { %v1999_v21 = vmul.f32 %v1995_v18, %v1995_v18 }
 0x24d   :  { %1103 = vrot.lane.b32.xlu0 %v1963_v14, %s1663_s11  ;;  %817 = vrot.lane.b32.xlu1 %v1975_v7, %s1661_s9 }
 0x24e   :  { %735 = vrot.lane.b32.xlu2 %v1957_v12, %s1663_s11 }
 0x252   :  { %v2011_v23 = vpop.f32.mrf.mxu2 }
 0x253   :  { %v2021_v24 = vmul.f32 %v2011_v23, %v2011_v23  ;;  %v2035_v27 = vpop.f32.mrf.mxu1 }
 0x254   :  { %v2051_v26 = vmul.f32 %v2035_v27, %v2035_v27 }
 0x255   :  { %1105 = vrot.lane.b32.xlu1 %v1975_v7, %s1663_s11  ;;  %803 = vrot.lane.b32.xlu0 %v1987_v17, %s1661_s9  ;;  %2554 = vst [vmem:[#allocation12_spill] sm:$0xff] %v2021_v24 }
 0x256   :  { %723 = vrot.lane.b32.xlu2 %v1977_v16, %s1663_s11  ;;  %2556 = vst [vmem:[#allocation14_spill] sm:$0xff] %v2051_v26 }
 0x25a   :  { %v2023_v19 = vpop.f32.mrf.mxu2 }
 0x25b   :  { %v2033_v25 = vmul.f32 %v2023_v19, %v2023_v19  ;;  %v2053_v29 = vpop.f32.mrf.mxu1 }
 0x25c   :  { %v2063_v31 = vmul.f32 %v2053_v29, %v2053_v29 }
 0x25d   :  { %1091 = vrot.lane.b32.xlu0 %v1987_v17, %s1663_s11  ;;  %805 = vrot.lane.b32.xlu1 %v1999_v21, %s1661_s9 }
 0x25e   :  { %831 = vrot.lane.b32.xlu2 %v2003_v22, %s1661_s9  ;;  %2557 = vst [vmem:[#allocation15_spill] sm:$0xff] %v2063_v31 }
 0x262   :  { %v2043_v3 = vpop.f32.mrf.mxu2 }
 0x263   :  { %v2047_v28 = vmul.f32 %v2043_v3, %v2043_v3  ;;  %v2071_v37 = vpop.f32.mrf.mxu1 }
 0x264   :  { %v2075_v32 = vmul.f32 %v2071_v37, %v2071_v37 }
 0x265   :  { %737 = vrot.lane.b32.xlu0 %v1971_v20, %s1663_s11  ;;  %1093 = vrot.lane.b32.xlu1 %v1999_v21, %s1663_s11  ;;  %2555 = vst [vmem:[#allocation13_spill] sm:$0xff] %v2047_v28 }
 0x266   :  { %1119 = vrot.lane.b32.xlu2 %v2003_v22, %s1663_s11  ;;  %2558 = vst [vmem:[#allocation16_spill] sm:$0xff] %v2075_v32 }
 0x26a   :  { %v2083_v33 = vpop.f32.mrf.mxu2 }
 0x26b   :  { %v2093_v36 = vmul.f32 %v2083_v33, %v2083_v33  ;;  %v2109_v30 = vpop.f32.mrf.mxu1 }
 0x26c   :  { %v2125_v42 = vmul.f32 %v2109_v30, %v2109_v30 }
 0x26d   :  { %725 = vrot.lane.b32.xlu0 %v1995_v18, %s1663_s11  ;;  %739 = vrot.lane.b32.xlu1 %v2011_v23, %s1663_s11  ;;  %2559 = vst [vmem:[#allocation17_spill] sm:$0xff] %v2093_v36 }
 0x26e   :  { %819 = vrot.lane.b32.xlu2 %v2021_v24, %s1661_s9  ;;  %2562 = vst [vmem:[#allocation20_spill] sm:$0xff] %v2125_v42 }
 0x272   :  { %v2095_v38 = vpop.f32.mrf.mxu2 }
 0x273   :  { %v2107_v50 = vmul.f32 %v2095_v38, %v2095_v38 }
 0x275   :  { %821 = vrot.lane.b32.xlu0 %v2033_v25, %s1661_s9  ;;  %727 = vrot.lane.b32.xlu1 %v2035_v27, %s1663_s11  ;;  %2560 = vst [vmem:[#allocation18_spill] sm:$0xff] %v2107_v50 }
 0x276   :  { %1107 = vrot.lane.b32.xlu2 %v2021_v24, %s1663_s11 }
 0x27a   :  { %v2117_v39 = vpop.f32.mrf.mxu2 }
 0x27b   :  { %v2121_v41 = vmul.f32 %v2117_v39, %v2117_v39 }
 0x27d   :  { %1109 = vrot.lane.b32.xlu0 %v2033_v25, %s1663_s11  ;;  %823 = vrot.lane.b32.xlu1 %v2047_v28, %s1661_s9  ;;  %2561 = vst [vmem:[#allocation19_spill] sm:$0xff] %v2121_v41 }
 0x27e   :  { %807 = vrot.lane.b32.xlu2 %v2051_v26, %s1661_s9 }
 0x285   :  { %1111 = vrot.lane.b32.xlu1 %v2047_v28, %s1663_s11  ;;  %809 = vrot.lane.b32.xlu0 %v2063_v31, %s1661_s9 }
 0x286   :  { %1095 = vrot.lane.b32.xlu2 %v2051_v26, %s1663_s11 }
 0x28d   :  { %1097 = vrot.lane.b32.xlu0 %v2063_v31, %s1663_s11  ;;  %811 = vrot.lane.b32.xlu1 %v2075_v32, %s1661_s9 }
 0x28e   :  { %741 = vrot.lane.b32.xlu2 %v2023_v19, %s1663_s11 }
 0x295   :  { %743 = vrot.lane.b32.xlu0 %v2043_v3, %s1663_s11  ;;  %1099 = vrot.lane.b32.xlu1 %v2075_v32, %s1663_s11 }
 0x296   :  { %729 = vrot.lane.b32.xlu2 %v2053_v29, %s1663_s11 }
 0x298   :  { %v802_v34 = vpop.permute.xlu2 %801 }
 0x299   :  { %v2156_v52 = vsub.f32 %v1947_v9, %v802_v34 }
 0x29d   :  { %731 = vrot.lane.b32.xlu0 %v2071_v37, %s1663_s11  ;;  %745 = vrot.lane.b32.xlu1 %v2083_v33, %s1663_s11 }
 0x29e   :  { %825 = vrot.lane.b32.xlu2 %v2093_v36, %s1661_s9 }
 0x2a0   :  { %v2103_v5 = vpop.permute.xlu2 %1089 }
 0x2a5   :  { %827 = vrot.lane.b32.xlu0 %v2107_v50, %s1661_s9  ;;  %733 = vrot.lane.b32.xlu1 %v2109_v30, %s1663_s11 }
 0x2a6   :  { %1113 = vrot.lane.b32.xlu2 %v2093_v36, %s1663_s11 }
 0x2a8   :  { %v736_v40 = vpop.permute.xlu2 %735 }
 0x2a9   :  { %v2140_v47 = vmul.f32 %v736_v40, %v1957_v12 }
 0x2ad   :  { %1115 = vrot.lane.b32.xlu0 %v2107_v50, %s1663_s11  ;;  %829 = vrot.lane.b32.xlu1 %v2121_v41, %s1661_s9 }
 0x2ae   :  { %v722_v43 = vpop.permute.xlu1 %721  ;;  %813 = vrot.lane.b32.xlu2 %v2125_v42, %s1661_s9 }
 0x2af   :  { %v2143_v48 = vmul.f32 %v722_v43, %v1947_v9 }
 0x2b0   :  { %v724_v44 = vpop.permute.xlu2 %723 }
 0x2b1   :  { %v2159_v53 = vmul.f32 %v724_v44, %v1977_v16 }
 0x2b5   :  { %749 = vrot.lane.b32.xlu0 %v2117_v39, %s1663_s11  ;;  %1117 = vrot.lane.b32.xlu1 %v2121_v41, %s1663_s11 }
 0x2b6   :  { %v752_v46 = vpop.permute.xlu1 %751  ;;  %1101 = vrot.lane.b32.xlu2 %v2125_v42, %s1663_s11 }
 0x2b7   :  { %v816_v35 = vpop.permute.xlu0 %815  ;;  %v2171_v58 = vmul.f32 %v752_v46, %v1959_v13 }
 0x2b8   :  { %v832_v63 = vpop.permute.xlu2 %831  ;;  %v2168_v57 = vsub.f32 %v1957_v12, %v816_v35 }
 0x2b9   :  { %v2182_v61 = vsub.f32 %v1959_v13, %v832_v63 }
 0x2bd   :  { %881 = vrot.lane.b32.xlu0 %v2143_v48, %s1662_s10  ;;  %895 = vrot.lane.b32.xlu1 %v2140_v47, %s1662_s10 }
 0x2be   :  { %747 = vrot.lane.b32.xlu2 %v2095_v38, %s1663_s11 }
 0x2bf   :  { %v2151_v49 = vpop.permute.xlu0 %1103  ;;  %v818_v11 = vpop.permute.xlu1 %817 }
 0x2c0   :  { %v2153_v51 = vpop.permute.xlu2 %1119  ;;  %v2211_v46 = vsub.f32 %v1971_v20, %v818_v11 }
 0x2c5   :  { %1185 = vrot.lane.b32.xlu0 %v2156_v52, %s1663_s11  ;;  %883 = vrot.lane.b32.xlu1 %v2159_v53, %s1662_s10 }
 0x2c7   :  { %v2165_v45 = vpop.permute.xlu1 %1105  ;;  %v804_v55 = vpop.permute.xlu0 %803 }
 0x2c8   :  { %v820_v56 = vpop.permute.xlu2 %819  ;;  %v2185_v15 = vsub.f32 %v1977_v16, %v804_v55 }
 0x2cd   :  { %911 = vrot.lane.b32.xlu0 %v2171_v58, %s1662_s10  ;;  %1199 = vrot.lane.b32.xlu1 %v2168_v57, %s1663_s11 }
 0x2cf   :  { %v2177_v59 = vpop.permute.xlu0 %1091  ;;  %v806_v60 = vpop.permute.xlu1 %805 }
 0x2d0   :  { %v2179_v54 = vpop.permute.xlu2 %1107 }
 0x2d1   :  { %2563 = vst [vmem:[#allocation21_spill] sm:$0xff] %v2179_v54 }
 0x2d5   :  { %1215 = vrot.lane.b32.xlu0 %v2182_v61, %s1663_s11  ;;  %1187 = vrot.lane.b32.xlu1 %v2185_v15, %s1663_s11 }
 0x2d7   :  { %v738_v0 = vpop.permute.xlu0 %737  ;;  %v2191_v1 = vpop.permute.xlu1 %1093 }
 0x2d8   :  { %v2194_v2 = vmul.f32 %v738_v0, %v1971_v20  ;;  %v808_v4 = vpop.permute.xlu2 %807 }
 0x2d9   :  { %v2245_v41 = vsub.f32 %v2035_v27, %v808_v4 }
 0x2da   :  { %897 = vrot.lane.b32.xlu2 %v2194_v2, %s1662_s10 }
 0x2df   :  { %v726_v6 = vpop.permute.xlu0 %725  ;;  %v740_v62 = vpop.permute.xlu1 %739 }
 0x2e0   :  { %v2199_v8 = vmul.f32 %v726_v6, %v1995_v18  ;;  %v2202_v34 = vmul.f32 %v740_v62, %v2011_v23  ;;  %v2204_v40 = vpop.permute.xlu2 %1095  ;;  %v2228_v6 = vsub.f32 %v2011_v23, %v820_v56  ;;  %v2231_v62 = vsub.f32 %v1995_v18, %v806_v60 }
 0x2e1   :  { %2566 = vst [vmem:[#allocation24_spill] sm:$0xff] %v2204_v40 }
 0x2e2   :  { %2564 = vst [vmem:[#allocation22_spill] sm:$0xff] %v2199_v8  ;;  %899 = vrot.lane.b32.xlu0 %v2202_v34, %s1662_s10  ;;  %885 = vrot.lane.b32.xlu2 %v2199_v8, %s1662_s10 }
 0x2e3   :  { %2565 = vst [vmem:[#allocation23_spill] sm:$0xff] %v2202_v34 }
 0x2e7   :  { %v822_v43 = vpop.permute.xlu0 %821  ;;  %v728_v44 = vpop.permute.xlu1 %727 }
 0x2e8   :  { %v2214_v35 = vmul.f32 %v728_v44, %v2035_v27  ;;  %v742_v63 = vpop.permute.xlu2 %741  ;;  %v2248_v36 = vsub.f32 %v2023_v19, %v822_v43 }
 0x2e9   :  { %v2217_v55 = vmul.f32 %v742_v63, %v2023_v19 }
 0x2ea   :  { %2567 = vst [vmem:[#allocation25_spill] sm:$0xff] %v2214_v35  ;;  %887 = vrot.lane.b32.xlu0 %v2214_v35, %s1662_s10  ;;  %1201 = vrot.lane.b32.xlu2 %v2211_v46, %s1663_s11 }
 0x2eb   :  { %2568 = vst [vmem:[#allocation26_spill] sm:$0xff] %v2217_v55  ;;  %901 = vrot.lane.b32.xlu1 %v2217_v55, %s1662_s10 }
 0x2ef   :  { %v2225_v0 = vpop.permute.xlu0 %1109  ;;  %v824_v11 = vpop.permute.xlu1 %823 }
 0x2f0   :  { %2569 = vst [vmem:[#allocation27_spill] sm:$0xff] %v2225_v0  ;;  %v730_v44 = vpop.permute.xlu2 %729 }
 0x2f1   :  { %v2234_v63 = vmul.f32 %v730_v44, %v2053_v29 }
 0x2f2   :  { %1203 = vrot.lane.b32.xlu0 %v2228_v6, %s1663_s11  ;;  %1189 = vrot.lane.b32.xlu2 %v2231_v62, %s1663_s11 }
 0x2f3   :  { %2570 = vst [vmem:[#allocation28_spill] sm:$0xff] %v2234_v63  ;;  %889 = vrot.lane.b32.xlu1 %v2234_v63, %s1662_s10 }
 0x2f7   :  { %v2242_v42 = vpop.permute.xlu1 %1111  ;;  %v810_v56 = vpop.permute.xlu0 %809 }
 0x2f8   :  { %2571 = vst [vmem:[#allocation29_spill] sm:$0xff] %v2242_v42  ;;  %v826_v60 = vpop.permute.xlu2 %825  ;;  %v2259_v35 = vsub.f32 %v2053_v29, %v810_v56 }
 0x2fa   :  { %1191 = vrot.lane.b32.xlu0 %v2245_v41, %s1663_s11 }
 0x2fb   :  { %1205 = vrot.lane.b32.xlu1 %v2248_v36, %s1663_s11 }
 0x2ff   :  { %v2254_v44 = vpop.permute.xlu0 %1097  ;;  %v812_v32 = vpop.permute.xlu1 %811 }
 0x300   :  { %2572 = vst [vmem:[#allocation30_spill] sm:$0xff] %v2254_v44  ;;  %v2256_v50 = vpop.permute.xlu2 %1113 }
 0x301   :  { %2573 = vst [vmem:[#allocation31_spill] sm:$0xff] %v2256_v50 }
 0x303   :  { %1193 = vrot.lane.b32.xlu1 %v2259_v35, %s1663_s11 }
 0x307   :  { %v744_v4 = vpop.permute.xlu0 %743  ;;  %v2263_v43 = vpop.permute.xlu1 %1099 }
 0x308   :  { %2574 = vst [vmem:[#allocation32_spill] sm:$0xff] %v2263_v43  ;;  %v2266_v42 = vmul.f32 %v744_v4, %v2043_v3  ;;  %v814_v28 = vpop.permute.xlu2 %813 }
 0x30a   :  { %2575 = vst [vmem:[#allocation33_spill] sm:$0xff] %v2266_v42  ;;  %903 = vrot.lane.b32.xlu2 %v2266_v42, %s1662_s10  ;;  %v2283_v42 = vsub.f32 %v2043_v3, %v824_v11 }
 0x30f   :  { %v732_v40 = vpop.permute.xlu0 %731  ;;  %v746_v26 = vpop.permute.xlu1 %745 }
 0x310   :  { %v2271_v50 = vmul.f32 %v732_v40, %v2071_v37  ;;  %v2274_v56 = vmul.f32 %v746_v26, %v2083_v33  ;;  %v2276_v63 = vpop.permute.xlu2 %1101 }
 0x311   :  { %2578 = vst [vmem:[#allocation36_spill] sm:$0xff] %v2276_v63 }
 0x312   :  { %2576 = vst [vmem:[#allocation34_spill] sm:$0xff] %v2271_v50  ;;  %905 = vrot.lane.b32.xlu0 %v2274_v56, %s1662_s10  ;;  %891 = vrot.lane.b32.xlu2 %v2271_v50, %s1662_s10 }
 0x313   :  { %2577 = vst [vmem:[#allocation35_spill] sm:$0xff] %v2274_v56  ;;  %v2300_v56 = vsub.f32 %v2083_v33, %v826_v60  ;;  %v2317_v60 = vsub.f32 %v2109_v30, %v814_v28 }
 0x317   :  { %v828_v4 = vpop.permute.xlu0 %827  ;;  %v734_v43 = vpop.permute.xlu1 %733 }
 0x318   :  { %v2286_v34 = vmul.f32 %v734_v43, %v2109_v30  ;;  %v748_v40 = vpop.permute.xlu2 %747  ;;  %v2303_v43 = vsub.f32 %v2071_v37, %v812_v32 }
 0x319   :  { %v2289_v26 = vmul.f32 %v748_v40, %v2095_v38  ;;  %v2306_v40 = vsub.f32 %v2095_v38, %v828_v4 }
 0x31a   :  { %2579 = vst [vmem:[#allocation37_spill] sm:$0xff] %v2286_v34  ;;  %893 = vrot.lane.b32.xlu0 %v2286_v34, %s1662_s10  ;;  %1207 = vrot.lane.b32.xlu2 %v2283_v42, %s1663_s11 }
 0x31b   :  { %2580 = vst [vmem:[#allocation38_spill] sm:$0xff] %v2289_v26  ;;  %907 = vrot.lane.b32.xlu1 %v2289_v26, %s1662_s10 }
 0x31f   :  { %v2297_v63 = vpop.permute.xlu0 %1115  ;;  %v830_v11 = vpop.permute.xlu1 %829 }
 0x320   :  { %2581 = vst [vmem:[#allocation39_spill] sm:$0xff] %v2297_v63  ;;  %v2327_v63 = vsub.f32 %v2117_v39, %v830_v11 }
 0x322   :  { %1209 = vrot.lane.b32.xlu0 %v2300_v56, %s1663_s11  ;;  %1195 = vrot.lane.b32.xlu2 %v2303_v43, %s1663_s11 }
 0x323   :  { %1211 = vrot.lane.b32.xlu1 %v2306_v40, %s1663_s11 }
 0x327   :  { %v750_v34 = vpop.permute.xlu0 %749  ;;  %v2314_v50 = vpop.permute.xlu1 %1117 }
 0x328   :  { %2582 = vst [vmem:[#allocation40_spill] sm:$0xff] %v2314_v50  ;;  %v2320_v32 = vmul.f32 %v750_v34, %v2117_v39 }
 0x32a   :  { %2583 = vst [vmem:[#allocation41_spill] sm:$0xff] %v2320_v32  ;;  %909 = vrot.lane.b32.xlu2 %v2320_v32, %s1662_s10  ;;  %1197 = vrot.lane.b32.xlu0 %v2317_v60, %s1663_s11 }
 0x32f   :  { %v882_v4 = vpop.permute.xlu0 %881  ;;  %v896_v26 = vpop.permute.xlu1 %895 }
 0x330   :  { %v929_v44 = vsub.f32 %v1947_v9, %v882_v4  ;;  %v936_v50 = vsub.f32 %v1957_v12, %v896_v26 }
 0x332   :  { %v977_v28 = vmul.f32 2.0, %v929_v44  ;;  %1213 = vrot.lane.b32.xlu2 %v2327_v63, %s1663_s11  ;;  %v984_v31 = vmul.f32 2.0, %v936_v50 }
 0x334   :  { %v993_v34 = vadd.f32 0.0009, %v977_v28  ;;  %v898_v54 = vpop.permute.xlu2 %897  ;;  %v1000_v11 = vadd.f32 0.0009, %v984_v31 }
 0x335   :  { %v937_v32 = vsub.f32 %v1971_v20, %v898_v54 }
 0x336   :  { %1025 = vrot.lane.b32.xlu1 %v993_v34, %s1662_s10 }
 0x337   :  { %v985_v24 = vmul.f32 2.0, %v937_v32  ;;  %v1186_v55 = vpop.permute.xlu0 %1185  ;;  %v884_v8 = vpop.permute.xlu1 %883 }
 0x338   :  { %v1233_v0 = vadd.f32 %v1186_v55, %v2156_v52  ;;  %v930_v31 = vsub.f32 %v1977_v16, %v884_v8 }
 0x339   :  { %v1001_v9 = vadd.f32 0.0009, %v985_v24 }
 0x33a   :  { %1039 = vrot.lane.b32.xlu2 %v1000_v11, %s1662_s10  ;;  %v1249_v12 = vadd.f32 0.0009, %v1233_v0  ;;  %v978_v4 = vmul.f32 2.0, %v930_v31 }
 0x33b   :  { %1041 = vrot.lane.b32.xlu0 %v1001_v9, %s1662_s10 }
 0x33c   :  { %v886_v44 = vpop.permute.xlu2 %885  ;;  %v994_v16 = vadd.f32 0.0009, %v978_v4 }
 0x33d   :  { %v931_v28 = vsub.f32 %v1995_v18, %v886_v44 }
 0x33e   :  { %1281 = vrot.lane.b32.xlu1 %v1249_v12, %s1664_s12 }
 0x33f   :  { %v912_v50 = vpop.permute.xlu0 %911  ;;  %v1200_v20 = vpop.permute.xlu1 %1199 }
 0x340   :  { %v944_v54 = vsub.f32 %v1959_v13, %v912_v50  ;;  %v1240_v26 = vadd.f32 %v1200_v20, %v2168_v57  ;;  %v979_v57 = vmul.f32 2.0, %v931_v28 }
 0x342   :  { %v992_v32 = vmul.f32 2.0, %v944_v54  ;;  %v1256_v52 = vadd.f32 0.0009, %v1240_v26 }
 0x344   :  { %v1008_v24 = vadd.f32 0.0009, %v992_v32  ;;  %1295 = vrot.lane.b32.xlu2 %v1256_v52, %s1664_s12  ;;  %v1202_v55 = vpop.permute.xlu2 %1201 }
 0x345   :  { %v1241_v0 = vadd.f32 %v1202_v55, %v2211_v46  ;;  %v995_v46 = vadd.f32 0.0009, %v979_v57 }
 0x346   :  { %1055 = vrot.lane.b32.xlu1 %v1008_v24, %s1662_s10 }
 0x347   :  { %v1257_v34 = vadd.f32 0.0009, %v1241_v0  ;;  %v1216_v11 = vpop.permute.xlu0 %1215  ;;  %v1188_v8 = vpop.permute.xlu1 %1187 }
 0x348   :  { %v1248_v13 = vadd.f32 %v1216_v11, %v2182_v61  ;;  %v1234_v12 = vadd.f32 %v1188_v8, %v2185_v15 }
 0x349   :  { %1297 = vrot.lane.b32.xlu0 %v1257_v34, %s1664_s12 }
 0x34a   :  { %v1264_v9 = vadd.f32 0.0009, %v1248_v13  ;;  %v1250_v18 = vadd.f32 0.0009, %v1234_v12 }
 0x34c   :  { %1027 = vrot.lane.b32.xlu2 %v994_v16, %s1662_s10  ;;  %v1190_v50 = vpop.permute.xlu2 %1189 }
 0x34d   :  { %v1235_v44 = vadd.f32 %v1190_v50, %v2231_v62 }
 0x34e   :  { %1311 = vrot.lane.b32.xlu1 %v1264_v9, %s1664_s12 }
 0x34f   :  { %v1251_v54 = vadd.f32 0.0009, %v1235_v44 }
 0x351   :  { %1029 = vrot.lane.b32.xlu0 %v995_v46, %s1662_s10 }
 0x354   :  { %v900_v61 = vpop.permute.xlu0 %899  ;;  %1283 = vrot.lane.b32.xlu2 %v1250_v18, %s1664_s12 }
 0x355   :  { %v938_v20 = vsub.f32 %v2011_v23, %v900_v61 }
 0x357   :  { %v986_v26 = vmul.f32 2.0, %v938_v20 }
 0x359   :  { %v1002_v31 = vadd.f32 0.0009, %v986_v26  ;;  %1285 = vrot.lane.b32.xlu0 %v1251_v54, %s1664_s12 }
 0x35b   :  { %1043 = vrot.lane.b32.xlu1 %v1002_v31, %s1662_s10 }
 0x35c   :  { %v888_v15 = vpop.permute.xlu0 %887 }
 0x35d   :  { %v902_v32 = vpop.permute.xlu1 %901  ;;  %v932_v34 = vsub.f32 %v2035_v27, %v888_v15 }
 0x35e   :  { %v939_v52 = vsub.f32 %v2023_v19, %v902_v32 }
 0x35f   :  { %v980_v57 = vmul.f32 2.0, %v932_v34 }
 0x360   :  { %v987_v24 = vmul.f32 2.0, %v939_v52 }
 0x361   :  { %v996_v12 = vadd.f32 0.0009, %v980_v57 }
 0x362   :  { %v1003_v55 = vadd.f32 0.0009, %v987_v24 }
 0x364   :  { %v1204_v0 = vpop.permute.xlu0 %1203  ;;  %v904_v62 = vpop.permute.xlu2 %903  ;;  %1045 = vrot.lane.b32.xlu2 %v1003_v55, %s1662_s10 }
 0x365   :  { %v1242_v4 = vadd.f32 %v1204_v0, %v2228_v6  ;;  %v940_v23 = vsub.f32 %v2043_v3, %v904_v62  ;;  %v890_v28 = vpop.permute.xlu1 %889 }
 0x366   :  { %v933_v6 = vsub.f32 %v2053_v29, %v890_v28 }
 0x367   :  { %v1258_v11 = vadd.f32 0.0009, %v1242_v4  ;;  %v988_v13 = vmul.f32 2.0, %v940_v23 }
 0x368   :  { %v981_v50 = vmul.f32 2.0, %v933_v6 }
 0x369   :  { %v1004_v16 = vadd.f32 0.0009, %v988_v13  ;;  %1299 = vrot.lane.b32.xlu1 %v1258_v11, %s1664_s12 }
 0x36b   :  { %1047 = vrot.lane.b32.xlu0 %v1004_v16, %s1662_s10 }
 0x36c   :  { %v892_v19 = vpop.permute.xlu2 %891  ;;  %v1192_v46 = vpop.permute.xlu0 %1191 }
 0x36d   :  { %v1206_v8 = vpop.permute.xlu1 %1205  ;;  %v1236_v27 = vadd.f32 %v1192_v46, %v2245_v41  ;;  %v934_v20 = vsub.f32 %v2071_v37, %v892_v19  ;;  %v1144_v46 = vadd.f32 %v2151_v49, %v1963_v14 }
 0x36e   :  { %v1243_v9 = vadd.f32 %v1206_v8, %v2248_v36  ;;  %v997_v36 = vadd.f32 0.0009, %v981_v50 }
 0x36f   :  { %v1252_v61 = vadd.f32 0.0009, %v1236_v27  ;;  %v982_v29 = vmul.f32 2.0, %v934_v20 }
 0x370   :  { %v1259_v3 = vadd.f32 0.0009, %v1243_v9 }
 0x371   :  { %1031 = vrot.lane.b32.xlu1 %v996_v12, %s1662_s10  ;;  %v998_v15 = vadd.f32 0.0009, %v982_v29  ;;  %v1138_v29 = vadd.f32 %v2177_v59, %v1987_v17  ;;  %v1145_v59 = vadd.f32 %v2165_v45, %v1975_v7 }
 0x372   :  { %1301 = vrot.lane.b32.xlu2 %v1259_v3, %s1664_s12 }
 0x374   :  { %v1208_v18 = vpop.permute.xlu2 %1207 }
 0x375   :  { %v1244_v44 = vadd.f32 %v1208_v18, %v2283_v42  ;;  %v1194_v26 = vpop.permute.xlu1 %1193 }
 0x376   :  { %v1237_v31 = vadd.f32 %v1194_v26, %v2259_v35 }
 0x377   :  { %v1260_v54 = vadd.f32 0.0009, %v1244_v44 }
 0x378   :  { %v1253_v32 = vadd.f32 0.0009, %v1237_v31  ;;  %v1154_v31 = vadd.f32 0.0001, %v1138_v29 }
 0x379   :  { %1287 = vrot.lane.b32.xlu1 %v1252_v61, %s1664_s12  ;;  %1303 = vrot.lane.b32.xlu0 %v1260_v54, %s1664_s12 }
 0x37a   :  { %1033 = vrot.lane.b32.xlu2 %v997_v36, %s1662_s10 }
 0x37c   :  { %v1196_v41 = vpop.permute.xlu2 %1195 }
 0x37d   :  { %v1238_v37 = vadd.f32 %v1196_v41, %v2303_v43 }
 0x37f   :  { %v1254_v55 = vadd.f32 0.0009, %v1238_v37 }
 0x381   :  { %1035 = vrot.lane.b32.xlu0 %v998_v15, %s1662_s10 }
 0x382   :  { %1289 = vrot.lane.b32.xlu2 %v1253_v32, %s1664_s12 }
 0x384   :  { %v906_v42 = vpop.permute.xlu0 %905  ;;  %v910_v52 = vpop.permute.xlu2 %909 }
 0x385   :  { %v941_v24 = vsub.f32 %v2083_v33, %v906_v42  ;;  %v943_v62 = vsub.f32 %v2117_v39, %v910_v52  ;;  %v945_v52 = vmul.f32 2.0, %v2143_v48  ;;  %v1152_v48 = vadd.f32 %v2153_v51, %v2003_v22 }
 0x386   :  { %v1139_v51 = vadd.f32 %v2191_v1, %v1999_v21  ;;  %v2586_v21 = vld [vmem:[#allocation26_spill] sm:$0xff] }
 0x387   :  { %v989_v0 = vmul.f32 2.0, %v941_v24  ;;  %v991_v35 = vmul.f32 2.0, %v943_v62  ;;  %v960_v24 = vmul.f32 2.0, %v2171_v58  ;;  %v1168_v7 = vadd.f32 0.0001, %v1152_v48 }
 0x388   :  { %v955_v1 = vmul.f32 2.0, %v2586_v21 }
 0x389   :  { %v1005_v4 = vadd.f32 0.0009, %v989_v0  ;;  %1291 = vrot.lane.b32.xlu0 %v1254_v55, %s1664_s12  ;;  %v1007_v43 = vadd.f32 0.0009, %v991_v35  ;;  %v976_v62 = vadd.f32 0.0001, %v960_v24 }
 0x38b   :  { %1049 = vrot.lane.b32.xlu1 %v1005_v4, %s1662_s10 }
 0x38c   :  { %v894_v23 = vpop.permute.xlu0 %893  ;;  %v1214_v28 = vpop.permute.xlu2 %1213 }
 0x38d   :  { %v908_v34 = vpop.permute.xlu1 %907  ;;  %v1247_v16 = vadd.f32 %v1214_v28, %v2327_v63  ;;  %v935_v12 = vsub.f32 %v2109_v30, %v894_v23 }
 0x38e   :  { %v942_v11 = vsub.f32 %v2095_v38, %v908_v34  ;;  %v1161_v34 = vadd.f32 0.0001, %v1145_v59 }
 0x38f   :  { %v1263_v6 = vadd.f32 0.0009, %v1247_v16  ;;  %v983_v3 = vmul.f32 2.0, %v935_v12 }
 0x390   :  { %v990_v13 = vmul.f32 2.0, %v942_v11 }
 0x391   :  { %1053 = vrot.lane.b32.xlu0 %v1007_v43, %s1662_s10  ;;  %v999_v50 = vadd.f32 0.0009, %v983_v3 }
 0x392   :  { %v1006_v33 = vadd.f32 0.0009, %v990_v13  ;;  %v953_v13 = vmul.f32 2.0, %v2194_v2  ;;  %v2584_v2 = vld [vmem:[#allocation27_spill] sm:$0xff] }
 0x394   :  { %v1210_v57 = vpop.permute.xlu0 %1209  ;;  %1051 = vrot.lane.b32.xlu2 %v1006_v33, %s1662_s10  ;;  %v1040_v8 = vpop.permute.xlu2 %1039  ;;  %v969_v33 = vadd.f32 0.0001, %v953_v13 }
 0x395   :  { %v1245_v39 = vadd.f32 %v1210_v57, %v2300_v56  ;;  %v1212_v19 = vpop.permute.xlu1 %1211  ;;  %v1160_v56 = vadd.f32 0.0001, %v1144_v46  ;;  %v1155_v46 = vadd.f32 0.0001, %v1139_v51 }
 0x396   :  { %v1246_v9 = vadd.f32 %v1212_v19, %v2306_v40  ;;  %v952_v40 = vmul.f32 2.0, %v2140_v47  ;;  %v1137_v47 = vadd.f32 %v2103_v5, %v1953_v10  ;;  %v961_v5 = vadd.f32 0.0001, %v945_v52 }
 0x397   :  { %v1261_v38 = vadd.f32 0.0009, %v1245_v39 }
 0x398   :  { %v1262_v63 = vadd.f32 0.0009, %v1246_v9  ;;  %v968_v49 = vadd.f32 0.0001, %v952_v40  ;;  %v1153_v15 = vadd.f32 0.0001, %v1137_v47 }
 0x399   :  { %1305 = vrot.lane.b32.xlu1 %v1261_v38, %s1664_s12  ;;  %1309 = vrot.lane.b32.xlu0 %v1263_v6, %s1664_s12  ;;  %v1147_v6 = vadd.f32 %v2584_v2, %v2033_v25 }
 0x39a   :  { %v1080_v44 = vmul.f32 %v1040_v8, %v968_v49 }
 0x39c   :  { %1307 = vrot.lane.b32.xlu2 %v1262_v63, %s1664_s12  ;;  %v1198_v30 = vpop.permute.xlu0 %1197 }
 0x39d   :  { %v1239_v14 = vadd.f32 %v1198_v30, %v2317_v60  ;;  %v946_v60 = vmul.f32 2.0, %v2159_v53  ;;  %v2585_v30 = vld [vmem:[#allocation22_spill] sm:$0xff] }
 0x39e   :  { %v1296_v27 = vpop.permute.xlu2 %1295 }
 0x39f   :  { %v1336_v18 = vmul.f32 %v1296_v27, %v1160_v56  ;;  %v1255_v54 = vadd.f32 0.0009, %v1239_v14  ;;  %v962_v17 = vadd.f32 0.0001, %v946_v60  ;;  %v1163_v56 = vadd.f32 0.0001, %v1147_v6 }
 0x3a0   :  { %v947_v14 = vmul.f32 2.0, %v2585_v30  ;;  %v2589_v60 = vld [vmem:[#allocation15_spill] sm:$0xff] }
 0x3a1   :  { %1519 = vrcp.f32 %v1336_v18  ;;  %1037 = vrot.lane.b32.xlu1 %v999_v50, %s1662_s10 }
 0x3a2   :  { %v963_v25 = vadd.f32 0.0001, %v947_v14 }
 0x3a6   :  { %v1028_v61 = vpop.permute.xlu2 %1027 }
 0x3a7   :  { %v1520_v20 = vpop.eup %1519  ;;  %v1074_v10 = vmul.f32 %v1028_v61, %v962_v17 }
 0x3a8   :  { %v1026_v36 = vpop.permute.xlu1 %1025  ;;  %v1368_v26 = vmul.f32 %v1520_v20, %v1080_v44  ;;  %v971_v44 = vadd.f32 0.0001, %v955_v1 }
 0x3a9   :  { %1293 = vrot.lane.b32.xlu1 %v1255_v54, %s1664_s12  ;;  %v1073_v4 = vmul.f32 %v1026_v36, %v961_v5  ;;  %v2591_v5 = vld [vmem:[#allocation23_spill] sm:$0xff] }
 0x3aa   :  { %v1398_v40 = vsel %vm416_vm0, %v1368_v26, 0.0 }
 0x3ad   :  { %v1042_v55 = vpop.permute.xlu0 %1041 }
 0x3ae   :  { %v1284_v41 = vpop.permute.xlu2 %1283  ;;  %v1081_v39 = vmul.f32 %v1042_v55, %v969_v33 }
 0x3af   :  { %v1330_v32 = vmul.f32 %v1284_v41, %v1154_v31  ;;  %v2587_v41 = vld [vmem:[#allocation12_spill] sm:$0xff] }
 0x3b0   :  { %v1282_v37 = vpop.permute.xlu1 %1281 }
 0x3b1   :  { %1521 = vrcp.f32 %v1330_v32  ;;  %v1329_v42 = vmul.f32 %v1282_v37, %v1153_v15  ;;  %v2588_v15 = vld [vmem:[#allocation21_spill] sm:$0xff]  ;;  %v2590_v37 = vld [vmem:[#allocation30_spill] sm:$0xff] }
 0x3b2   :  { %v1146_v26 = vadd.f32 %v2588_v15, %v2587_v41 }
 0x3b3   :  { %1523 = vrcp.f32 %v1329_v42  ;;  %v1141_v42 = vadd.f32 %v2590_v37, %v2589_v60 }
 0x3b4   :  { %v1162_v24 = vadd.f32 0.0001, %v1146_v26  ;;  %v2603_v26 = vld [vmem:[#allocation38_spill] sm:$0xff] }
 0x3b5   :  { %v1157_v55 = vadd.f32 0.0001, %v1141_v42  ;;  %v958_v60 = vmul.f32 2.0, %v2603_v26 }
 0x3b7   :  { %v1522_v0 = vpop.eup %1521 }
 0x3b8   :  { %v1056_v35 = vpop.permute.xlu1 %1055  ;;  %v1362_v53 = vmul.f32 %v1522_v0, %v1074_v10  ;;  %v954_v0 = vmul.f32 2.0, %v2591_v5 }
 0x3b9   :  { %v1524_v23 = vpop.eup %1523  ;;  %v1088_v28 = vmul.f32 %v1056_v35, %v976_v62 }
 0x3ba   :  { %v1361_v11 = vmul.f32 %v1524_v23, %v1073_v4  ;;  %v1380_v57 = vsel %vm416_vm0, %v1362_v53, 0.0  ;;  %v2592_v4 = vld [vmem:[#allocation28_spill] sm:$0xff]  ;;  %v970_v53 = vadd.f32 0.0001, %v954_v0 }
 0x3bb   :  { %v1298_v58 = vpop.permute.xlu0 %1297  ;;  %v949_v35 = vmul.f32 2.0, %v2592_v4 }
 0x3bc   :  { %v1337_v43 = vmul.f32 %v1298_v58, %v1161_v34  ;;  %v1377_v12 = vsel %vm416_vm0, %v1361_v11, 0.0 }
 0x3bd   :  { %v965_v23 = vadd.f32 0.0001, %v949_v35 }
 0x3be   :  { %1525 = vrcp.f32 %v1337_v43  ;;  %v1046_v9 = vpop.permute.xlu2 %1045 }
 0x3bf   :  { %v1083_v36 = vmul.f32 %v1046_v9, %v971_v44 }
 0x3c0   :  { %v1312_v45 = vpop.permute.xlu1 %1311 }
 0x3c1   :  { %v1344_v16 = vmul.f32 %v1312_v45, %v1168_v7  ;;  %v2593_v7 = vld [vmem:[#allocation14_spill] sm:$0xff]  ;;  %v2594_v45 = vld [vmem:[#allocation24_spill] sm:$0xff] }
 0x3c2   :  { %v1140_v33 = vadd.f32 %v2594_v45, %v2593_v7 }
 0x3c3   :  { %1527 = vrcp.f32 %v1344_v16  ;;  %v1030_v19 = vpop.permute.xlu0 %1029  ;;  %1381 = vadd.xlane.f32.xlu0 %v1380_v57  ;;  %v2595_v16 = vld [vmem:[#allocation13_spill] sm:$0xff] }
 0x3c4   :  { %v1526_v8 = vpop.eup %1525  ;;  %v1075_v61 = vmul.f32 %v1030_v19, %v963_v25  ;;  %v2596_v57 = vld [vmem:[#allocation29_spill] sm:$0xff]  ;;  %v1156_v9 = vadd.f32 0.0001, %v1140_v33 }
 0x3c5   :  { %1378 = vadd.xlane.f32.xlu2 %v1377_v12  ;;  %v1369_v22 = vmul.f32 %v1526_v8, %v1081_v39  ;;  %v1148_v39 = vadd.f32 %v2596_v57, %v2595_v16 }
 0x3c7   :  { %v1401_v63 = vsel %vm416_vm0, %v1369_v22, 0.0  ;;  %v1164_v12 = vadd.f32 0.0001, %v1148_v39 }
 0x3c9   :  { %v1528_v38 = vpop.eup %1527 }
 0x3ca   :  { %v2417_v3 = vmul.f32 %v1528_v38, %v1088_v28  ;;  %v2597_v38 = vld [vmem:[#allocation25_spill] sm:$0xff] }
 0x3cb   :  { %v1286_v27 = vpop.permute.xlu0 %1285  ;;  %1402 = vadd.xlane.f32.xlu0 %v1401_v63  ;;  %v2598_v63 = vld [vmem:[#allocation33_spill] sm:$0xff] }
 0x3cc   :  { %v1331_v50 = vmul.f32 %v1286_v27, %v1155_v46  ;;  %v1302_v18 = vpop.permute.xlu2 %1301  ;;  %v948_v46 = vmul.f32 2.0, %v2597_v38 }
 0x3cd   :  { %v1339_v49 = vmul.f32 %v1302_v18, %v1163_v56  ;;  %1399 = vadd.xlane.f32.xlu2 %v1398_v40  ;;  %v1044_v20 = vpop.permute.xlu1 %1043  ;;  %v956_v56 = vmul.f32 2.0, %v2598_v63  ;;  %v2600_v18 = vld [vmem:[#allocation39_spill] sm:$0xff] }
 0x3ce   :  { %1529 = vrcp.f32 %v1331_v50  ;;  %v1082_v28 = vmul.f32 %v1044_v20, %v970_v53  ;;  %v2599_v50 = vld [vmem:[#allocation18_spill] sm:$0xff]  ;;  %v964_v30 = vadd.f32 0.0001, %v948_v46 }
 0x3cf   :  { %1531 = vrcp.f32 %v1339_v49  ;;  %v1150_v40 = vadd.f32 %v2600_v18, %v2599_v50  ;;  %v972_v14 = vadd.f32 0.0001, %v956_v56 }
 0x3d4   :  { %v1530_v54 = vpop.eup %1529  ;;  %v1034_v29 = vpop.permute.xlu2 %1033 }
 0x3d5   :  { %v1532_v47 = vpop.eup %1531  ;;  %v1363_v31 = vmul.f32 %v1530_v54, %v1075_v61  ;;  %v1077_v58 = vmul.f32 %v1034_v29, %v965_v23  ;;  %v1166_v61 = vadd.f32 0.0001, %v1150_v40  ;;  %v2601_v54 = vld [vmem:[#allocation16_spill] sm:$0xff] }
 0x3d6   :  { %v2424_v32 = vmul.f32 %v1532_v47, %v1083_v36  ;;  %v2602_v36 = vld [vmem:[#allocation32_spill] sm:$0xff] }
 0x3d7   :  { %v1383_v52 = vsel %vm416_vm0, %v1363_v31, 0.0  ;;  %v1142_v29 = vadd.f32 %v2602_v36, %v2601_v54  ;;  %v2611_v40 = vld [vmem:[#allocation20_spill] sm:$0xff] }
 0x3d8   :  { %1384 = vadd.xlane.f32.xlu1 %v1383_v52  ;;  %v1407_v0 = vsel %vm416_vm0, %v2424_v32, 0.0 }
 0x3d9   :  { %v1158_v42 = vadd.f32 0.0001, %v1142_v29 }
 0x3db   :  { %v1300_v17 = vpop.permute.xlu1 %1299 }
 0x3dc   :  { %v1338_v59 = vmul.f32 %v1300_v17, %v1162_v24  ;;  %v1290_v10 = vpop.permute.xlu2 %1289  ;;  %v974_v24 = vadd.f32 0.0001, %v958_v60  ;;  %v2604_v17 = vld [vmem:[#allocation34_spill] sm:$0xff] }
 0x3dd   :  { %v1333_v62 = vmul.f32 %v1290_v10, %v1157_v55  ;;  %v1048_v34 = vpop.permute.xlu0 %1047 }
 0x3de   :  { %1533 = vrcp.f32 %v1338_v59  ;;  %v1084_v25 = vmul.f32 %v1048_v34, %v972_v14  ;;  %v950_v59 = vmul.f32 2.0, %v2604_v17 }
 0x3df   :  { %1535 = vrcp.f32 %v1333_v62 }
 0x3e0   :  { %v966_v4 = vadd.f32 0.0001, %v950_v59 }
 0x3e3   :  { %v1032_v11 = vpop.permute.xlu1 %1031 }
 0x3e4   :  { %v1534_v48 = vpop.eup %1533  ;;  %v1076_v49 = vmul.f32 %v1032_v11, %v964_v30  ;;  %v2605_v11 = vld [vmem:[#allocation17_spill] sm:$0xff]  ;;  %v2612_v30 = vld [vmem:[#allocation36_spill] sm:$0xff] }
 0x3e5   :  { %v1536_v43 = vpop.eup %1535  ;;  %v1370_v13 = vmul.f32 %v1534_v48, %v1082_v28  ;;  %v2606_v48 = vld [vmem:[#allocation31_spill] sm:$0xff]  ;;  %v1143_v14 = vadd.f32 %v2612_v30, %v2611_v40 }
 0x3e6   :  { %v1365_v19 = vmul.f32 %v1536_v43, %v1077_v58  ;;  %v1149_v58 = vadd.f32 %v2606_v48, %v2605_v11  ;;  %v2607_v43 = vld [vmem:[#allocation19_spill] sm:$0xff] }
 0x3e7   :  { %v1404_v8 = vsel %vm416_vm0, %v1370_v13, 0.0  ;;  %v2608_v13 = vld [vmem:[#allocation40_spill] sm:$0xff] }
 0x3e8   :  { %1405 = vadd.xlane.f32.xlu1 %v1404_v8  ;;  %v1151_v7 = vadd.f32 %v2608_v13, %v2607_v43  ;;  %v1389_v33 = vsel %vm416_vm0, %v1365_v19, 0.0  ;;  %v1165_v32 = vadd.f32 0.0001, %v1149_v58 }
 0x3ea   :  { %v1167_v16 = vadd.f32 0.0001, %v1151_v7 }
 0x3eb   :  { %v1288_v22 = vpop.permute.xlu1 %1287  ;;  %v1304_v51 = vpop.permute.xlu0 %1303 }
 0x3ec   :  { %v1332_v2 = vmul.f32 %v1288_v22, %v1156_v9  ;;  %v1340_v6 = vmul.f32 %v1304_v51, %v1164_v12  ;;  %v2609_v12 = vld [vmem:[#allocation35_spill] sm:$0xff]  ;;  %v2610_v51 = vld [vmem:[#allocation41_spill] sm:$0xff] }
 0x3ed   :  { %v957_v22 = vmul.f32 2.0, %v2609_v12 }
 0x3ee   :  { %1537 = vrcp.f32 %v1332_v2  ;;  %v1052_v27 = vpop.permute.xlu2 %1051  ;;  %v959_v2 = vmul.f32 2.0, %v2610_v51 }
 0x3ef   :  { %1539 = vrcp.f32 %v1340_v6  ;;  %v1086_v10 = vmul.f32 %v1052_v27, %v974_v24  ;;  %v973_v38 = vadd.f32 0.0001, %v957_v22 }
 0x3f0   :  { %v975_v46 = vadd.f32 0.0001, %v959_v2 }
 0x3f3   :  { %v1036_v21 = vpop.permute.xlu0 %1035 }
 0x3f4   :  { %v1538_v1 = vpop.eup %1537  ;;  %v1078_v35 = vmul.f32 %v1036_v21, %v966_v4 }
 0x3f5   :  { %v1540_v44 = vpop.eup %1539  ;;  %v1364_v20 = vmul.f32 %v1538_v1, %v1076_v49 }
 0x3f6   :  { %v1308_v47 = vpop.permute.xlu2 %1307  ;;  %v1372_v31 = vmul.f32 %v1540_v44, %v1084_v25  ;;  %v1159_v25 = vadd.f32 0.0001, %v1143_v14 }
 0x3f7   :  { %v1342_v41 = vmul.f32 %v1308_v47, %v1166_v61  ;;  %v1386_v15 = vsel %vm416_vm0, %v1364_v20, 0.0  ;;  %v2613_v20 = vld [vmem:[#allocation37_spill] sm:$0xff] }
 0x3f8   :  { %1387 = vadd.xlane.f32.xlu2 %v1386_v15  ;;  %v1410_v37 = vsel %vm416_vm0, %v1372_v31, 0.0  ;;  %v951_v54 = vmul.f32 2.0, %v2613_v20  ;;  %v1422_v15 = vsel %vm416_vm0, %v2417_v3, 0.0 }
 0x3f9   :  { %1541 = vrcp.f32 %v1342_v41  ;;  %1411 = vadd.xlane.f32.xlu0 %v1410_v37 }
 0x3fa   :  { %v967_v36 = vadd.f32 0.0001, %v951_v54 }
 0x3fb   :  { %v1292_v52 = vpop.permute.xlu0 %1291 }
 0x3fc   :  { %v1334_v55 = vmul.f32 %v1292_v52, %v1158_v42 }
 0x3fd   :  { %v1050_v53 = vpop.permute.xlu1 %1049 }
 0x3fe   :  { %1543 = vrcp.f32 %v1334_v55  ;;  %v1085_v19 = vmul.f32 %v1050_v53, %v973_v38 }
 0x3ff   :  { %v1542_v5 = vpop.eup %1541 }
 0x400   :  { %1408 = vadd.xlane.f32.xlu2 %v1407_v0  ;;  %v1374_v62 = vmul.f32 %v1542_v5, %v1086_v10 }
 0x402   :  { %v1416_v6 = vsel %vm416_vm0, %v1374_v62, 0.0 }
 0x403   :  { %v1054_v23 = vpop.permute.xlu0 %1053 }
 0x404   :  { %v1544_v28 = vpop.eup %1543  ;;  %v1087_v27 = vmul.f32 %v1054_v23, %v975_v46 }
 0x405   :  { %v1366_v34 = vmul.f32 %v1544_v28, %v1078_v35 }
 0x407   :  { %v1392_v45 = vsel %vm416_vm0, %v1366_v34, 0.0 }
 0x408   :  { %1393 = vadd.xlane.f32.xlu0 %v1392_v45  ;;  %1390 = vadd.xlane.f32.xlu2 %v1389_v33 }
 0x40b   :  { %v1306_v57 = vpop.permute.xlu1 %1305  ;;  %v1310_v39 = vpop.permute.xlu0 %1309 }
 0x40c   :  { %v1341_v8 = vmul.f32 %v1306_v57, %v1165_v32  ;;  %v1343_v9 = vmul.f32 %v1310_v39, %v1167_v16 }
 0x40e   :  { %1545 = vrcp.f32 %v1341_v8 }
 0x40f   :  { %1547 = vrcp.f32 %v1343_v9 }
 0x410   :  { %1417 = vadd.xlane.f32.xlu2 %v1416_v6 }
 0x413   :  { %v1038_v63 = vpop.permute.xlu1 %1037 }
 0x414   :  { %v1546_v56 = vpop.eup %1545  ;;  %v1079_v29 = vmul.f32 %v1038_v63, %v967_v36 }
 0x415   :  { %v1548_v50 = vpop.eup %1547  ;;  %v1373_v18 = vmul.f32 %v1546_v56, %v1085_v19 }
 0x416   :  { %v1375_v49 = vmul.f32 %v1548_v50, %v1087_v27 }
 0x417   :  { %v1413_v21 = vsel %vm416_vm0, %v1373_v18, 0.0 }
 0x418   :  { %1414 = vadd.xlane.f32.xlu1 %v1413_v21  ;;  %v1419_v1 = vsel %vm416_vm0, %v1375_v49, 0.0 }
 0x419   :  { %1420 = vadd.xlane.f32.xlu0 %v1419_v1 }
 0x41b   :  { %v1294_v44 = vpop.permute.xlu1 %1293 }
 0x41c   :  { %v1335_v61 = vmul.f32 %v1294_v44, %v1159_v25 }
 0x41e   :  { %1549 = vrcp.f32 %v1335_v61 }
 0x424   :  { %v1550_v47 = vpop.eup %1549 }
 0x425   :  { %v1367_v31 = vmul.f32 %v1550_v47, %v1079_v29 }
 0x427   :  { %v1395_v41 = vsel %vm416_vm0, %v1367_v31, 0.0 }
 0x428   :  { %1396 = vadd.xlane.f32.xlu1 %v1395_v41 }
 0x430   :  { %1423 = vadd.xlane.f32.xlu1 %v1422_v15 }
 0x436   :  { %v1382_v26 = vpop.xlane.xlu0 %1381 }
 0x437   :  { %1427 = vst.msk [vmem:[%s2533_s4 + $0x8] sm:$0xff] %vm1425_vm5, %v1382_v26 }
 0x438   :  { %v1379_v60 = vpop.xlane.xlu2 %1378 }
 0x439   :  { %1426 = vst.msk [vmem:[%s2533_s4] sm:$0xff] %vm1425_vm5, %v1379_v60 }
 0x43e   :  { %v1403_v37 = vpop.xlane.xlu0 %1402 }
 0x43f   :  { %1434 = vst.msk [vmem:[%s2533_s4 + $0x40] sm:$0xff] %vm1425_vm5, %v1403_v37 }
 0x440   :  { %v1400_v3 = vpop.xlane.xlu2 %1399 }
 0x441   :  { %1433 = vst.msk [vmem:[%s2533_s4 + $0x38] sm:$0xff] %vm1425_vm5, %v1400_v3 }
 0x44b   :  { %v1385_v42 = vpop.xlane.xlu1 %1384 }
 0x44c   :  { %1428 = vst.msk [vmem:[%s2533_s4 + $0x10] sm:$0xff] %vm1425_vm5, %v1385_v42 }
 0x45b   :  { %v1406_v52 = vpop.xlane.xlu1 %1405 }
 0x45c   :  { %1435 = vst.msk [vmem:[%s2533_s4 + $0x48] sm:$0xff] %vm1425_vm5, %v1406_v52 }
 0x46b   :  { %v1388_v24 = vpop.xlane.xlu2 %1387 }
 0x46c   :  { %v1412_v55 = vpop.xlane.xlu0 %1411  ;;  %1429 = vst.msk [vmem:[%s2533_s4 + $0x18] sm:$0xff] %vm1425_vm5, %v1388_v24 }
 0x46d   :  { %1437 = vst.msk [vmem:[%s2533_s4 + $0x58] sm:$0xff] %vm1425_vm5, %v1412_v55 }
 0x473   :  { %v1409_v17 = vpop.xlane.xlu2 %1408 }
 0x474   :  { %1436 = vst.msk [vmem:[%s2533_s4 + $0x50] sm:$0xff] %vm1425_vm5, %v1409_v17 }
 0x47b   :  { %v1394_v59 = vpop.xlane.xlu0 %1393  ;;  %v1391_v10 = vpop.xlane.xlu2 %1390 }
 0x47c   :  { %1431 = vst.msk [vmem:[%s2533_s4 + $0x28] sm:$0xff] %vm1425_vm5, %v1394_v59 }
 0x47d   :  { %1430 = vst.msk [vmem:[%s2533_s4 + $0x20] sm:$0xff] %vm1425_vm5, %v1391_v10 }
 0x483   :  { %v1418_v5 = vpop.xlane.xlu2 %1417 }
 0x484   :  { %1439 = vst.msk [vmem:[%s2533_s4 + $0x68] sm:$0xff] %vm1425_vm5, %v1418_v5 }
 0x48b   :  { %v1415_v0 = vpop.xlane.xlu1 %1414 }
 0x48c   :  { %1438 = vst.msk [vmem:[%s2533_s4 + $0x60] sm:$0xff] %vm1425_vm5, %v1415_v0  ;;  %v1421_v62 = vpop.xlane.xlu0 %1420 }
 0x48d   :  { %1440 = vst.msk [vmem:[%s2533_s4 + $0x70] sm:$0xff] %vm1425_vm5, %v1421_v62 }
 0x49b   :  { %v1397_v4 = vpop.xlane.xlu1 %1396 }
 0x49c   :  { %1432 = vst.msk [vmem:[%s2533_s4 + $0x30] sm:$0xff] %vm1425_vm5, %v1397_v4 }
 0x4a3   :  { %v1424_v35 = vpop.xlane.xlu1 %1423 }
 0x4a4   :  { %1441 = vst.msk [vmem:[%s2533_s4 + $0x78] sm:$0xff] %vm1425_vm5, %v1424_v35 }
 0x4a5   :  { %1446 = vsyncpa [#allocation3], 1 }
 0x4a6   :  { %1447 = vsyncpa [#allocation5], 1 }
 0x4a7   :  { %1448 = vsyncpa [#allocation8], 1 }

</bundles_post_ra>
